<compile_context>
chip_gen: v7x
topology: tpu7x:2x2x1
jax: 0.10.0
libtpu: 0.0.40
codegen_flags: <defaults>
</compile_context>

<pallas_src>
import functools

import jax
import jax.numpy as jnp
import numpy as np
from jax import lax
from jax.experimental import pallas as pl
from jax.experimental.pallas import tpu as pltpu


def _round_up(x, m):
    return ((x + m - 1) // m) * m


# ------------------------------- kernel -------------------------------------
def _deepar_kernel(z_ref, loc_ref, scale_ref, idx_ref, embtab_ref,
                   wp_ref, bp_ref,
                   wih_ref, whh_ref, bg_ref,
                   wh_ref, bh_ref,
                   out_ref,
                   seq_scr, gx_scr, *, batch_rows):
    LB, Cin = z_ref.shape
    Bp = batch_rows
    L = LB // Bp
    D = wp_ref.shape[1]
    n_layers = wih_ref.shape[0]
    n_feat = idx_ref.shape[1]
    K_emb = embtab_ref.shape[0]

    # ---- standardization('norm') + W_P projection --------------------------
    # one batched [L*Bp, Cin] x [Cin, D] matmul instead of L tiny matmuls
    zn = (z_ref[...] - loc_ref[...]) / scale_ref[...]
    x = jnp.dot(zn, wp_ref[...], preferred_element_type=jnp.float32) + bp_ref[...]

    # ---- feature embeddings: gather folded in-kernel as one-hot matmul -----
    idx_all = idx_ref[...]                                   # [LB, n_feat] i32
    iota = lax.broadcasted_iota(jnp.int32, (LB, K_emb), 1)
    onehot = jnp.zeros((LB, K_emb), jnp.float32)
    for f in range(n_feat):                                  # tiny static loop
        onehot = onehot + (idx_all[:, f:f + 1] == iota).astype(jnp.float32)
    x = x + jnp.dot(onehot, embtab_ref[...],
                    preferred_element_type=jnp.float32)
    seq_scr[...] = x

    # ---- multi-layer LSTM, gates packed into 4*D contiguous lanes ----------
    # TODO(synk): time-chunk gx_scr for long L (v7x 64 MiB VMEM budget).
    for layer in range(n_layers):
        # hoisted input-to-hidden contribution: one big MXU matmul per layer
        gx_scr[...] = (jnp.dot(seq_scr[...], wih_ref[layer],
                               preferred_element_type=jnp.float32)
                       + bg_ref[layer])

        def step(t, carry, layer=layer):
            h, c = carry
            r = pl.multiple_of(t * Bp, Bp)
            # only the h-recurrence matmul remains on the serial path
            gates = gx_scr[pl.ds(r, Bp), :] + jnp.dot(
                h, whh_ref[layer], preferred_element_type=jnp.float32)
            # divide-free sigmoid over the whole packed gate vector (1 vreg)
            sig = 0.5 * jnp.tanh(0.5 * gates) + 0.5
            i_g = sig[:, 0 * D:1 * D]
            f_g = sig[:, 1 * D:2 * D]
            o_g = sig[:, 3 * D:4 * D]
            g_g = jnp.tanh(gates[:, 2 * D:3 * D])
            c_new = f_g * c + i_g * g_g
            h_new = o_g * jnp.tanh(c_new)
            seq_scr[pl.ds(r, Bp), :] = h_new
            return h_new, c_new

        h0 = jnp.zeros((Bp, D), jnp.float32)
        c0 = jnp.zeros((Bp, D), jnp.float32)
        lax.fori_loop(0, L, step, (h0, c0),
                      unroll=L if L <= 32 else 16)

    # ---- head (Linear D -> Cout) + standardization('denorm') ---------------
    y = jnp.dot(seq_scr[...], wh_ref[...],
                preferred_element_type=jnp.float32) + bh_ref[...]
    out_ref[...] = y * scale_ref[...] + loc_ref[...]


# --------------------------- one-time weight prep -----------------------------
def prepare_fused_params(params):
    """Fuse/pack weights once (gate order i,f,g,o; stacked embedding tables)."""
    D = params["wp"].shape[1]
    wih_f = jnp.concatenate([params["wih"][:, g] for g in range(4)], axis=-1)
    whh_f = jnp.concatenate([params["whh"][:, g] for g in range(4)], axis=-1)
    bg_f = jnp.concatenate([params["bg"][:, g] for g in range(4)],
                           axis=-1)[:, None, :]
    nmax = max(int(t.shape[0]) for t in params["embs"])
    emb_tab = jnp.concatenate(
        [jnp.zeros((nmax, D), jnp.float32).at[:t.shape[0]].set(
            t.astype(jnp.float32)) for t in params["embs"]], axis=0)
    return {
        "wp": params["wp"].astype(jnp.float32),
        "bp": params["bp"].reshape(1, -1).astype(jnp.float32),
        "wih": wih_f.astype(jnp.float32),            # [n_layers, D, 4D]
        "whh": whh_f.astype(jnp.float32),            # [n_layers, D, 4D]
        "bg": bg_f.astype(jnp.float32),              # [n_layers, 1, 4D]
        "wh": params["wh"].astype(jnp.float32),
        "bh": params["bh"].reshape(1, -1).astype(jnp.float32),
        "emb_tab": emb_tab,                          # [n_feat*nmax, D]
        "nmax": nmax,
        "x_loc": params["x_loc"].astype(jnp.float32),
        "x_scale": params["x_scale"].astype(jnp.float32),
    }


# ------------------------------- wrapper -------------------------------------
def deepar_forward(z, features, fused):
    """z: [B, L, Cin] f32; features: list of [B, L] int32 (features[0]=station)."""
    B, L, Cin = z.shape
    D = fused["wp"].shape[1]
    Cout = fused["wh"].shape[1]
    # denorm reuses the input loc/scale; only valid when c_in == c_out
    assert Cin == Cout, "DeepAR denorm assumes c_in == c_out"
    nmax = fused["nmax"]

    SUB = 8
    Bp = _round_up(B, SUB)
    LB = L * Bp

    # glue: per-station loc/scale gather + time-major flattened layouts --------
    stations = features[0][:, 0]
    loc_b = fused["x_loc"][stations]                              # [B, C]
    scale_b = fused["x_scale"][stations]                          # [B, C]
    loc_p = jnp.zeros((Bp, Cin), jnp.float32).at[:B].set(loc_b)
    scale_p = jnp.ones((Bp, Cin), jnp.float32).at[:B].set(scale_b)
    loc_t = jnp.tile(loc_p, (L, 1))                               # [LB, C]
    scale_t = jnp.tile(scale_p, (L, 1))                           # [LB, C]

    z_tm = jnp.zeros((L, Bp, Cin), jnp.float32).at[:, :B].set(
        jnp.transpose(z.astype(jnp.float32), (1, 0, 2))).reshape(LB, Cin)

    idx_cols = []
    for f, feat in enumerate(features):
        ft = jnp.zeros((L, Bp), jnp.int32).at[:, :B].set(
            jnp.transpose(feat.astype(jnp.int32), (1, 0)))
        idx_cols.append(ft.reshape(LB) + f * nmax)
    idx = jnp.stack(idx_cols, axis=1)                             # [LB, n_feat]

    args = (z_tm, loc_t, scale_t, idx, fused["emb_tab"],
            fused["wp"], fused["bp"],
            fused["wih"], fused["whh"], fused["bg"],
            fused["wh"], fused["bh"])

    vmem = pl.BlockSpec(memory_space=pltpu.MemorySpace.VMEM)
    out_flat = pl.pallas_call(
        functools.partial(_deepar_kernel, batch_rows=Bp),
        out_shape=jax.ShapeDtypeStruct((LB, Cout), jnp.float32),
        in_specs=[vmem] * len(args),
        out_specs=vmem,
        scratch_shapes=[
            pltpu.VMEM((LB, D), jnp.float32),        # time-major seq buffer
            pltpu.VMEM((LB, 4 * D), jnp.float32),    # hoisted packed gate inputs
        ],
        # TODO(synk): per-generation vmem_limit tuning (raise on v5e/v6e,
        # keep <=~48 MiB on v7x) once L/B grow.
        compiler_params=pltpu.CompilerParams(
            vmem_limit_bytes=32 * 1024 * 1024),
    )(*args)

    out = out_flat.reshape(L, Bp, Cout)
    return jnp.transpose(out, (1, 0, 2))[:B]


# ------------------------------ reference ------------------------------------
def deepar_reference(z, features, params):
    stations = features[0][:, 0]
    loc = params["x_loc"][stations][:, None, :]
    scale = params["x_scale"][stations][:, None, :]
    x = (z - loc) / scale
    x = x @ params["wp"] + params["bp"]
    for i, table in enumerate(params["embs"]):
        x = x + table[features[i]]
    n_layers = params["wih"].shape[0]
    B, L, D = x.shape
    for l in range(n_layers):
        h = jnp.zeros((B, D), jnp.float32)
        c = jnp.zeros((B, D), jnp.float32)
        outs = []
        for t in range(L):
            xt = x[:, t, :]
            gates = []
            for g in range(4):
                gates.append(xt @ params["wih"][l, g] + h @ params["whh"][l, g]
                             + params["bg"][l, g])
            i_g = jax.nn.sigmoid(gates[0])
            f_g = jax.nn.sigmoid(gates[1])
            g_g = jnp.tanh(gates[2])
            o_g = jax.nn.sigmoid(gates[3])
            c = f_g * c + i_g * g_g
            h = o_g * jnp.tanh(c)
            outs.append(h)
        x = jnp.stack(outs, axis=1)
    y = x @ params["wh"] + params["bh"]
    return y * scale + loc


# ------------------------------ param init -----------------------------------
def init_params(key, num_embeds, d_model, n_layers, c_in, c_out):
    ks = jax.random.split(key, 10 + len(num_embeds))
    s = 1.0 / np.sqrt(d_model)
    p = {
        "wp":  jax.random.uniform(ks[0], (c_in, d_model), jnp.float32, -s, s),
        "bp":  jax.random.uniform(ks[1], (d_model,), jnp.float32, -s, s),
        "wih": jax.random.uniform(ks[2], (n_layers, 4, d_model, d_model),
                                  jnp.float32, -s, s),
        "whh": jax.random.uniform(ks[3], (n_layers, 4, d_model, d_model),
                                  jnp.float32, -s, s),
        "bg":  jax.random.uniform(ks[4], (n_layers, 4, d_model),
                                  jnp.float32, -s, s),
        "wh":  jax.random.uniform(ks[5], (d_model, c_out), jnp.float32, -s, s),
        "bh":  jax.random.uniform(ks[6], (c_out,), jnp.float32, -s, s),
        "x_loc":   jax.random.normal(ks[7], (num_embeds[0], c_in), jnp.float32),
        "x_scale": jax.random.uniform(ks[8], (num_embeds[0], c_in),
                                      jnp.float32, 0.5, 1.5),
        "embs": [jax.random.normal(ks[10 + i], (n, d_model), jnp.float32) * 0.1
                 for i, n in enumerate(num_embeds)],
    }
    return p


# --------------------------------- main ---------------------------------------
if __name__ == "__main__":
    B, L = 2, 8
    patch_len, factor = 1, 2            # forecast_target='both'
    c_in = c_out = patch_len * factor   # 2
    d_model, n_layers = 32, 2
    num_embeds = [5, 7]                 # [num_stations, num_other_feature]

    key = jax.random.PRNGKey(0)
    k_z, k_f0, k_f1, k_p = jax.random.split(key, 4)

    z = jax.random.normal(k_z, (B, L, c_in), jnp.float32)
    f0 = jax.random.randint(k_f0, (B, L), 0, num_embeds[0], jnp.int32)  # station
    f1 = jax.random.randint(k_f1, (B, L), 0, num_embeds[1], jnp.int32)
    features = [f0, f1]

    params = init_params(k_p, num_embeds, d_model, n_layers, c_in, c_out)
    fused = prepare_fused_params(params)          # one-time weight fusion/pack

    out = deepar_forward(z, features, fused)
    out = jax.block_until_ready(out)

    ref = deepar_reference(z, features, params)
    np.testing.assert_allclose(np.asarray(out), np.asarray(ref),
                               rtol=1e-4, atol=1e-4)
    print("KERNEL_OK")
</pallas_src>

<mosaic_0001>
module attributes {stable_mosaic.version = 11 : i64} {
  func.func @_deepar_kernel(%arg0: memref<64x2xf32, #tpu.memory_space<vmem>>, %arg1: memref<64x2xf32, #tpu.memory_space<vmem>>, %arg2: memref<64x2xf32, #tpu.memory_space<vmem>>, %arg3: memref<64x2xi32, #tpu.memory_space<vmem>>, %arg4: memref<14x32xf32, #tpu.memory_space<vmem>>, %arg5: memref<2x32xf32, #tpu.memory_space<vmem>>, %arg6: memref<1x32xf32, #tpu.memory_space<vmem>>, %arg7: memref<2x32x128xf32, #tpu.memory_space<vmem>>, %arg8: memref<2x32x128xf32, #tpu.memory_space<vmem>>, %arg9: memref<2x1x128xf32, #tpu.memory_space<vmem>>, %arg10: memref<32x2xf32, #tpu.memory_space<vmem>>, %arg11: memref<1x2xf32, #tpu.memory_space<vmem>>, %arg12: memref<64x2xf32, #tpu.memory_space<vmem>>, %arg13: memref<64x32xf32, #tpu.memory_space<vmem>>, %arg14: memref<64x128xf32, #tpu.memory_space<vmem>>) attributes {dimension_semantics = [], scalar_prefetch = 0 : i64, scratch_operands = 2 : i64, tpu.core_type = #tpu.core_type<tc>} {
    %c0 = arith.constant 0 : index
    %c0_0 = arith.constant 0 : index
    %0 = vector.load %arg0[%c0, %c0_0] : memref<64x2xf32, #tpu.memory_space<vmem>>, vector<64x2xf32>
    %c0_1 = arith.constant 0 : index
    %c0_2 = arith.constant 0 : index
    %1 = vector.load %arg1[%c0_1, %c0_2] : memref<64x2xf32, #tpu.memory_space<vmem>>, vector<64x2xf32>
    %2 = arith.subf %0, %1 : vector<64x2xf32>
    %c0_3 = arith.constant 0 : index
    %c0_4 = arith.constant 0 : index
    %3 = vector.load %arg2[%c0_3, %c0_4] : memref<64x2xf32, #tpu.memory_space<vmem>>, vector<64x2xf32>
    %4 = arith.divf %2, %3 : vector<64x2xf32>
    %c0_5 = arith.constant 0 : index
    %c0_6 = arith.constant 0 : index
    %5 = vector.load %arg5[%c0_5, %c0_6] : memref<2x32xf32, #tpu.memory_space<vmem>>, vector<2x32xf32>
    %cst = arith.constant dense<0.000000e+00> : vector<64x32xf32>
    %6 = tpu.matmul %4, %5, %cst {dimension_numbers = #tpu.dot_dimension_numbers<[1], [0], [0], [1], [0, 0, 1, 1], [], []>} : vector<64x2xf32>, vector<2x32xf32>, vector<64x32xf32> -> vector<64x32xf32>
    %c0_7 = arith.constant 0 : index
    %c0_8 = arith.constant 0 : index
    %7 = vector.load %arg6[%c0_7, %c0_8] : memref<1x32xf32, #tpu.memory_space<vmem>>, vector<1x32xf32>
    %8 = vector.broadcast %7 : vector<1x32xf32> to vector<64x32xf32>
    %9 = arith.addf %6, %8 : vector<64x32xf32>
    %c0_9 = arith.constant 0 : index
    %c0_10 = arith.constant 0 : index
    %10 = vector.load %arg3[%c0_9, %c0_10] : memref<64x2xi32, #tpu.memory_space<vmem>>, vector<64x2xi32>
    %11 = tpu.iota {dimensions = array<i32: 1>} : vector<64x14xi32>
    %cst_11 = arith.constant 0.000000e+00 : f32
    %12 = vector.broadcast %cst_11 : f32 to vector<64x14xf32>
    %13 = vector.extract_strided_slice %10 {offsets = [0, 0], sizes = [64, 1], strides = [1, 1]} : vector<64x2xi32> to vector<64x1xi32>
    %14 = vector.broadcast %13 : vector<64x1xi32> to vector<64x14xi32>
    %15 = arith.cmpi eq, %14, %11 : vector<64x14xi32>
    %16 = arith.extui %15 : vector<64x14xi1> to vector<64x14xi32>
    %17 = arith.sitofp %16 : vector<64x14xi32> to vector<64x14xf32>
    %18 = arith.addf %12, %17 : vector<64x14xf32>
    %19 = vector.extract_strided_slice %10 {offsets = [0, 1], sizes = [64, 1], strides = [1, 1]} : vector<64x2xi32> to vector<64x1xi32>
    %20 = vector.broadcast %19 : vector<64x1xi32> to vector<64x14xi32>
    %21 = arith.cmpi eq, %20, %11 : vector<64x14xi32>
    %22 = arith.extui %21 : vector<64x14xi1> to vector<64x14xi32>
    %23 = arith.sitofp %22 : vector<64x14xi32> to vector<64x14xf32>
    %24 = arith.addf %18, %23 : vector<64x14xf32>
    %c0_12 = arith.constant 0 : index
    %c0_13 = arith.constant 0 : index
    %25 = vector.load %arg4[%c0_12, %c0_13] : memref<14x32xf32, #tpu.memory_space<vmem>>, vector<14x32xf32>
    %cst_14 = arith.constant dense<0.000000e+00> : vector<64x32xf32>
    %26 = tpu.matmul %24, %25, %cst_14 {dimension_numbers = #tpu.dot_dimension_numbers<[1], [0], [0], [1], [0, 0, 1, 1], [], []>} : vector<64x14xf32>, vector<14x32xf32>, vector<64x32xf32> -> vector<64x32xf32>
    %27 = arith.addf %9, %26 : vector<64x32xf32>
    %c0_15 = arith.constant 0 : index
    %c0_16 = arith.constant 0 : index
    %28 = vector.load %arg13[%c0_15, %c0_16] : memref<64x32xf32, #tpu.memory_space<vmem>>, vector<64x32xf32>
    tpu.vector_store %arg13[%c0_15, %c0_16], %27 {strides = array<i32>} : memref<64x32xf32, #tpu.memory_space<vmem>>, vector<64x32xf32>,
    %c0_17 = arith.constant 0 : index
    %c0_18 = arith.constant 0 : index
    %29 = vector.load %arg13[%c0_17, %c0_18] : memref<64x32xf32, #tpu.memory_space<vmem>>, vector<64x32xf32>
    %c0_19 = arith.constant 0 : index
    %c0_20 = arith.constant 0 : index
    %c0_21 = arith.constant 0 : index
    %30 = vector.load %arg7[%c0_19, %c0_20, %c0_21] : memref<2x32x128xf32, #tpu.memory_space<vmem>>, vector<1x32x128xf32>
    %31 = vector.shape_cast %30 : vector<1x32x128xf32> to vector<32x128xf32>
    %cst_22 = arith.constant dense<0.000000e+00> : vector<64x128xf32>
    %32 = tpu.matmul %29, %31, %cst_22 {dimension_numbers = #tpu.dot_dimension_numbers<[1], [0], [0], [1], [0, 0, 1, 1], [], []>} : vector<64x32xf32>, vector<32x128xf32>, vector<64x128xf32> -> vector<64x128xf32>
    %c0_23 = arith.constant 0 : index
    %c0_24 = arith.constant 0 : index
    %c0_25 = arith.constant 0 : index
    %33 = vector.load %arg9[%c0_23, %c0_24, %c0_25] : memref<2x1x128xf32, #tpu.memory_space<vmem>>, vector<1x1x128xf32>
    %34 = vector.shape_cast %33 : vector<1x1x128xf32> to vector<1x128xf32>
    %35 = vector.broadcast %34 : vector<1x128xf32> to vector<64x128xf32>
    %36 = arith.addf %32, %35 : vector<64x128xf32>
    %c0_26 = arith.constant 0 : index
    %c0_27 = arith.constant 0 : index
    %37 = vector.load %arg14[%c0_26, %c0_27] : memref<64x128xf32, #tpu.memory_space<vmem>>, vector<64x128xf32>
    tpu.vector_store %arg14[%c0_26, %c0_27], %36 {strides = array<i32>} : memref<64x128xf32, #tpu.memory_space<vmem>>, vector<64x128xf32>,
    %cst_28 = arith.constant 0.000000e+00 : f32
    %38 = vector.broadcast %cst_28 : f32 to vector<8x32xf32>
    %cst_29 = arith.constant 0.000000e+00 : f32
    %39 = vector.broadcast %cst_29 : f32 to vector<8x32xf32>
    %c0_i32 = arith.constant 0 : i32
    %c8_i32 = arith.constant 8 : i32
    %40 = arith.muli %c0_i32, %c8_i32 : i32
    %41 = tpu.assume_multiple %40, 8 : i32
    %42 = arith.index_cast %41 : i32 to index
    %c0_30 = arith.constant 0 : index
    %43 = vector.load %arg14[%42, %c0_30] : memref<64x128xf32, #tpu.memory_space<vmem>>, vector<8x128xf32>
    %c0_31 = arith.constant 0 : index
    %c0_32 = arith.constant 0 : index
    %c0_33 = arith.constant 0 : index
    %44 = vector.load %arg8[%c0_31, %c0_32, %c0_33] : memref<2x32x128xf32, #tpu.memory_space<vmem>>, vector<1x32x128xf32>
    %45 = vector.shape_cast %44 : vector<1x32x128xf32> to vector<32x128xf32>
    %cst_34 = arith.constant dense<0.000000e+00> : vector<8x128xf32>
    %46 = tpu.matmul %38, %45, %cst_34 {dimension_numbers = #tpu.dot_dimension_numbers<[1], [0], [0], [1], [0, 0, 1, 1], [], []>} : vector<8x32xf32>, vector<32x128xf32>, vector<8x128xf32> -> vector<8x128xf32>
    %47 = arith.addf %43, %46 : vector<8x128xf32>
    %cst_35 = arith.constant 5.000000e-01 : f32
    %48 = vector.broadcast %cst_35 : f32 to vector<8x128xf32>
    %49 = arith.mulf %48, %47 : vector<8x128xf32>
    %50 = math.tanh %49 : vector<8x128xf32>
    %cst_36 = arith.constant 5.000000e-01 : f32
    %51 = vector.broadcast %cst_36 : f32 to vector<8x128xf32>
    %52 = arith.mulf %51, %50 : vector<8x128xf32>
    %cst_37 = arith.constant 5.000000e-01 : f32
    %53 = vector.broadcast %cst_37 : f32 to vector<8x128xf32>
    %54 = arith.addf %52, %53 : vector<8x128xf32>
    %55 = vector.extract_strided_slice %54 {offsets = [0, 0], sizes = [8, 32], strides = [1, 1]} : vector<8x128xf32> to vector<8x32xf32>
    %56 = vector.extract_strided_slice %54 {offsets = [0, 32], sizes = [8, 32], strides = [1, 1]} : vector<8x128xf32> to vector<8x32xf32>
    %57 = vector.extract_strided_slice %54 {offsets = [0, 96], sizes = [8, 32], strides = [1, 1]} : vector<8x128xf32> to vector<8x32xf32>
    %58 = vector.extract_strided_slice %47 {offsets = [0, 64], sizes = [8, 32], strides = [1, 1]} : vector<8x128xf32> to vector<8x32xf32>
    %59 = math.tanh %58 : vector<8x32xf32>
    %60 = arith.mulf %56, %39 : vector<8x32xf32>
    %61 = arith.mulf %55, %59 : vector<8x32xf32>
    %62 = arith.addf %60, %61 : vector<8x32xf32>
    %63 = math.tanh %62 : vector<8x32xf32>
    %64 = arith.mulf %57, %63 : vector<8x32xf32>
    %65 = arith.index_cast %41 : i32 to index
    %c0_38 = arith.constant 0 : index
    %66 = vector.load %arg13[%65, %c0_38] : memref<64x32xf32, #tpu.memory_space<vmem>>, vector<8x32xf32>
    tpu.vector_store %arg13[%65, %c0_38], %64 {strides = array<i32>} : memref<64x32xf32, #tpu.memory_space<vmem>>, vector<8x32xf32>,
    %c1_i32 = arith.constant 1 : i32
    %c8_i32_39 = arith.constant 8 : i32
    %67 = arith.muli %c1_i32, %c8_i32_39 : i32
    %68 = tpu.assume_multiple %67, 8 : i32
    %69 = arith.index_cast %68 : i32 to index
    %c0_40 = arith.constant 0 : index
    %70 = vector.load %arg14[%69, %c0_40] : memref<64x128xf32, #tpu.memory_space<vmem>>, vector<8x128xf32>
    %c0_41 = arith.constant 0 : index
    %c0_42 = arith.constant 0 : index
    %c0_43 = arith.constant 0 : index
    %71 = vector.load %arg8[%c0_41, %c0_42, %c0_43] : memref<2x32x128xf32, #tpu.memory_space<vmem>>, vector<1x32x128xf32>
    %72 = vector.shape_cast %71 : vector<1x32x128xf32> to vector<32x128xf32>
    %cst_44 = arith.constant dense<0.000000e+00> : vector<8x128xf32>
    %73 = tpu.matmul %64, %72, %cst_44 {dimension_numbers = #tpu.dot_dimension_numbers<[1], [0], [0], [1], [0, 0, 1, 1], [], []>} : vector<8x32xf32>, vector<32x128xf32>, vector<8x128xf32> -> vector<8x128xf32>
    %74 = arith.addf %70, %73 : vector<8x128xf32>
    %cst_45 = arith.constant 5.000000e-01 : f32
    %75 = vector.broadcast %cst_45 : f32 to vector<8x128xf32>
    %76 = arith.mulf %75, %74 : vector<8x128xf32>
    %77 = math.tanh %76 : vector<8x128xf32>
    %cst_46 = arith.constant 5.000000e-01 : f32
    %78 = vector.broadcast %cst_46 : f32 to vector<8x128xf32>
    %79 = arith.mulf %78, %77 : vector<8x128xf32>
    %cst_47 = arith.constant 5.000000e-01 : f32
    %80 = vector.broadcast %cst_47 : f32 to vector<8x128xf32>
    %81 = arith.addf %79, %80 : vector<8x128xf32>
    %82 = vector.extract_strided_slice %81 {offsets = [0, 0], sizes = [8, 32], strides = [1, 1]} : vector<8x128xf32> to vector<8x32xf32>
    %83 = vector.extract_strided_slice %81 {offsets = [0, 32], sizes = [8, 32], strides = [1, 1]} : vector<8x128xf32> to vector<8x32xf32>
    %84 = vector.extract_strided_slice %81 {offsets = [0, 96], sizes = [8, 32], strides = [1, 1]} : vector<8x128xf32> to vector<8x32xf32>
    %85 = vector.extract_strided_slice %74 {offsets = [0, 64], sizes = [8, 32], strides = [1, 1]} : vector<8x128xf32> to vector<8x32xf32>
    %86 = math.tanh %85 : vector<8x32xf32>
    %87 = arith.mulf %83, %62 : vector<8x32xf32>
    %88 = arith.mulf %82, %86 : vector<8x32xf32>
    %89 = arith.addf %87, %88 : vector<8x32xf32>
    %90 = math.tanh %89 : vector<8x32xf32>
    %91 = arith.mulf %84, %90 : vector<8x32xf32>
    %92 = arith.index_cast %68 : i32 to index
    %c0_48 = arith.constant 0 : index
    %93 = vector.load %arg13[%92, %c0_48] : memref<64x32xf32, #tpu.memory_space<vmem>>, vector<8x32xf32>
    tpu.vector_store %arg13[%92, %c0_48], %91 {strides = array<i32>} : memref<64x32xf32, #tpu.memory_space<vmem>>, vector<8x32xf32>,
    %c2_i32 = arith.constant 2 : i32
    %c8_i32_49 = arith.constant 8 : i32
    %94 = arith.muli %c2_i32, %c8_i32_49 : i32
    %95 = tpu.assume_multiple %94, 8 : i32
    %96 = arith.index_cast %95 : i32 to index
    %c0_50 = arith.constant 0 : index
    %97 = vector.load %arg14[%96, %c0_50] : memref<64x128xf32, #tpu.memory_space<vmem>>, vector<8x128xf32>
    %c0_51 = arith.constant 0 : index
    %c0_52 = arith.constant 0 : index
    %c0_53 = arith.constant 0 : index
    %98 = vector.load %arg8[%c0_51, %c0_52, %c0_53] : memref<2x32x128xf32, #tpu.memory_space<vmem>>, vector<1x32x128xf32>
    %99 = vector.shape_cast %98 : vector<1x32x128xf32> to vector<32x128xf32>
    %cst_54 = arith.constant dense<0.000000e+00> : vector<8x128xf32>
    %100 = tpu.matmul %91, %99, %cst_54 {dimension_numbers = #tpu.dot_dimension_numbers<[1], [0], [0], [1], [0, 0, 1, 1], [], []>} : vector<8x32xf32>, vector<32x128xf32>, vector<8x128xf32> -> vector<8x128xf32>
    %101 = arith.addf %97, %100 : vector<8x128xf32>
    %cst_55 = arith.constant 5.000000e-01 : f32
    %102 = vector.broadcast %cst_55 : f32 to vector<8x128xf32>
    %103 = arith.mulf %102, %101 : vector<8x128xf32>
    %104 = math.tanh %103 : vector<8x128xf32>
    %cst_56 = arith.constant 5.000000e-01 : f32
    %105 = vector.broadcast %cst_56 : f32 to vector<8x128xf32>
    %106 = arith.mulf %105, %104 : vector<8x128xf32>
    %cst_57 = arith.constant 5.000000e-01 : f32
    %107 = vector.broadcast %cst_57 : f32 to vector<8x128xf32>
    %108 = arith.addf %106, %107 : vector<8x128xf32>
    %109 = vector.extract_strided_slice %108 {offsets = [0, 0], sizes = [8, 32], strides = [1, 1]} : vector<8x128xf32> to vector<8x32xf32>
    %110 = vector.extract_strided_slice %108 {offsets = [0, 32], sizes = [8, 32], strides = [1, 1]} : vector<8x128xf32> to vector<8x32xf32>
    %111 = vector.extract_strided_slice %108 {offsets = [0, 96], sizes = [8, 32], strides = [1, 1]} : vector<8x128xf32> to vector<8x32xf32>
    %112 = vector.extract_strided_slice %101 {offsets = [0, 64], sizes = [8, 32], strides = [1, 1]} : vector<8x128xf32> to vector<8x32xf32>
    %113 = math.tanh %112 : vector<8x32xf32>
    %114 = arith.mulf %110, %89 : vector<8x32xf32>
    %115 = arith.mulf %109, %113 : vector<8x32xf32>
    %116 = arith.addf %114, %115 : vector<8x32xf32>
    %117 = math.tanh %116 : vector<8x32xf32>
    %118 = arith.mulf %111, %117 : vector<8x32xf32>
    %119 = arith.index_cast %95 : i32 to index
    %c0_58 = arith.constant 0 : index
    %120 = vector.load %arg13[%119, %c0_58] : memref<64x32xf32, #tpu.memory_space<vmem>>, vector<8x32xf32>
    tpu.vector_store %arg13[%119, %c0_58], %118 {strides = array<i32>} : memref<64x32xf32, #tpu.memory_space<vmem>>, vector<8x32xf32>,
    %c3_i32 = arith.constant 3 : i32
    %c8_i32_59 = arith.constant 8 : i32
    %121 = arith.muli %c3_i32, %c8_i32_59 : i32
    %122 = tpu.assume_multiple %121, 8 : i32
    %123 = arith.index_cast %122 : i32 to index
    %c0_60 = arith.constant 0 : index
    %124 = vector.load %arg14[%123, %c0_60] : memref<64x128xf32, #tpu.memory_space<vmem>>, vector<8x128xf32>
    %c0_61 = arith.constant 0 : index
    %c0_62 = arith.constant 0 : index
    %c0_63 = arith.constant 0 : index
    %125 = vector.load %arg8[%c0_61, %c0_62, %c0_63] : memref<2x32x128xf32, #tpu.memory_space<vmem>>, vector<1x32x128xf32>
    %126 = vector.shape_cast %125 : vector<1x32x128xf32> to vector<32x128xf32>
    %cst_64 = arith.constant dense<0.000000e+00> : vector<8x128xf32>
    %127 = tpu.matmul %118, %126, %cst_64 {dimension_numbers = #tpu.dot_dimension_numbers<[1], [0], [0], [1], [0, 0, 1, 1], [], []>} : vector<8x32xf32>, vector<32x128xf32>, vector<8x128xf32> -> vector<8x128xf32>
    %128 = arith.addf %124, %127 : vector<8x128xf32>
    %cst_65 = arith.constant 5.000000e-01 : f32
    %129 = vector.broadcast %cst_65 : f32 to vector<8x128xf32>
    %130 = arith.mulf %129, %128 : vector<8x128xf32>
    %131 = math.tanh %130 : vector<8x128xf32>
    %cst_66 = arith.constant 5.000000e-01 : f32
    %132 = vector.broadcast %cst_66 : f32 to vector<8x128xf32>
    %133 = arith.mulf %132, %131 : vector<8x128xf32>
    %cst_67 = arith.constant 5.000000e-01 : f32
    %134 = vector.broadcast %cst_67 : f32 to vector<8x128xf32>
    %135 = arith.addf %133, %134 : vector<8x128xf32>
    %136 = vector.extract_strided_slice %135 {offsets = [0, 0], sizes = [8, 32], strides = [1, 1]} : vector<8x128xf32> to vector<8x32xf32>
    %137 = vector.extract_strided_slice %135 {offsets = [0, 32], sizes = [8, 32], strides = [1, 1]} : vector<8x128xf32> to vector<8x32xf32>
    %138 = vector.extract_strided_slice %135 {offsets = [0, 96], sizes = [8, 32], strides = [1, 1]} : vector<8x128xf32> to vector<8x32xf32>
    %139 = vector.extract_strided_slice %128 {offsets = [0, 64], sizes = [8, 32], strides = [1, 1]} : vector<8x128xf32> to vector<8x32xf32>
    %140 = math.tanh %139 : vector<8x32xf32>
    %141 = arith.mulf %137, %116 : vector<8x32xf32>
    %142 = arith.mulf %136, %140 : vector<8x32xf32>
    %143 = arith.addf %141, %142 : vector<8x32xf32>
    %144 = math.tanh %143 : vector<8x32xf32>
    %145 = arith.mulf %138, %144 : vector<8x32xf32>
    %146 = arith.index_cast %122 : i32 to index
    %c0_68 = arith.constant 0 : index
    %147 = vector.load %arg13[%146, %c0_68] : memref<64x32xf32, #tpu.memory_space<vmem>>, vector<8x32xf32>
    tpu.vector_store %arg13[%146, %c0_68], %145 {strides = array<i32>} : memref<64x32xf32, #tpu.memory_space<vmem>>, vector<8x32xf32>,
    %c4_i32 = arith.constant 4 : i32
    %c8_i32_69 = arith.constant 8 : i32
    %148 = arith.muli %c4_i32, %c8_i32_69 : i32
    %149 = tpu.assume_multiple %148, 8 : i32
    %150 = arith.index_cast %149 : i32 to index
    %c0_70 = arith.constant 0 : index
    %151 = vector.load %arg14[%150, %c0_70] : memref<64x128xf32, #tpu.memory_space<vmem>>, vector<8x128xf32>
    %c0_71 = arith.constant 0 : index
    %c0_72 = arith.constant 0 : index
    %c0_73 = arith.constant 0 : index
    %152 = vector.load %arg8[%c0_71, %c0_72, %c0_73] : memref<2x32x128xf32, #tpu.memory_space<vmem>>, vector<1x32x128xf32>
    %153 = vector.shape_cast %152 : vector<1x32x128xf32> to vector<32x128xf32>
    %cst_74 = arith.constant dense<0.000000e+00> : vector<8x128xf32>
    %154 = tpu.matmul %145, %153, %cst_74 {dimension_numbers = #tpu.dot_dimension_numbers<[1], [0], [0], [1], [0, 0, 1, 1], [], []>} : vector<8x32xf32>, vector<32x128xf32>, vector<8x128xf32> -> vector<8x128xf32>
    %155 = arith.addf %151, %154 : vector<8x128xf32>
    %cst_75 = arith.constant 5.000000e-01 : f32
    %156 = vector.broadcast %cst_75 : f32 to vector<8x128xf32>
    %157 = arith.mulf %156, %155 : vector<8x128xf32>
    %158 = math.tanh %157 : vector<8x128xf32>
    %cst_76 = arith.constant 5.000000e-01 : f32
    %159 = vector.broadcast %cst_76 : f32 to vector<8x128xf32>
    %160 = arith.mulf %159, %158 : vector<8x128xf32>
    %cst_77 = arith.constant 5.000000e-01 : f32
    %161 = vector.broadcast %cst_77 : f32 to vector<8x128xf32>
    %162 = arith.addf %160, %161 : vector<8x128xf32>
    %163 = vector.extract_strided_slice %162 {offsets = [0, 0], sizes = [8, 32], strides = [1, 1]} : vector<8x128xf32> to vector<8x32xf32>
    %164 = vector.extract_strided_slice %162 {offsets = [0, 32], sizes = [8, 32], strides = [1, 1]} : vector<8x128xf32> to vector<8x32xf32>
    %165 = vector.extract_strided_slice %162 {offsets = [0, 96], sizes = [8, 32], strides = [1, 1]} : vector<8x128xf32> to vector<8x32xf32>
    %166 = vector.extract_strided_slice %155 {offsets = [0, 64], sizes = [8, 32], strides = [1, 1]} : vector<8x128xf32> to vector<8x32xf32>
    %167 = math.tanh %166 : vector<8x32xf32>
    %168 = arith.mulf %164, %143 : vector<8x32xf32>
    %169 = arith.mulf %163, %167 : vector<8x32xf32>
    %170 = arith.addf %168, %169 : vector<8x32xf32>
    %171 = math.tanh %170 : vector<8x32xf32>
    %172 = arith.mulf %165, %171 : vector<8x32xf32>
    %173 = arith.index_cast %149 : i32 to index
    %c0_78 = arith.constant 0 : index
    %174 = vector.load %arg13[%173, %c0_78] : memref<64x32xf32, #tpu.memory_space<vmem>>, vector<8x32xf32>
    tpu.vector_store %arg13[%173, %c0_78], %172 {strides = array<i32>} : memref<64x32xf32, #tpu.memory_space<vmem>>, vector<8x32xf32>,
    %c5_i32 = arith.constant 5 : i32
    %c8_i32_79 = arith.constant 8 : i32
    %175 = arith.muli %c5_i32, %c8_i32_79 : i32
    %176 = tpu.assume_multiple %175, 8 : i32
    %177 = arith.index_cast %176 : i32 to index
    %c0_80 = arith.constant 0 : index
    %178 = vector.load %arg14[%177, %c0_80] : memref<64x128xf32, #tpu.memory_space<vmem>>, vector<8x128xf32>
    %c0_81 = arith.constant 0 : index
    %c0_82 = arith.constant 0 : index
    %c0_83 = arith.constant 0 : index
    %179 = vector.load %arg8[%c0_81, %c0_82, %c0_83] : memref<2x32x128xf32, #tpu.memory_space<vmem>>, vector<1x32x128xf32>
    %180 = vector.shape_cast %179 : vector<1x32x128xf32> to vector<32x128xf32>
    %cst_84 = arith.constant dense<0.000000e+00> : vector<8x128xf32>
    %181 = tpu.matmul %172, %180, %cst_84 {dimension_numbers = #tpu.dot_dimension_numbers<[1], [0], [0], [1], [0, 0, 1, 1], [], []>} : vector<8x32xf32>, vector<32x128xf32>, vector<8x128xf32> -> vector<8x128xf32>
    %182 = arith.addf %178, %181 : vector<8x128xf32>
    %cst_85 = arith.constant 5.000000e-01 : f32
    %183 = vector.broadcast %cst_85 : f32 to vector<8x128xf32>
    %184 = arith.mulf %183, %182 : vector<8x128xf32>
    %185 = math.tanh %184 : vector<8x128xf32>
    %cst_86 = arith.constant 5.000000e-01 : f32
    %186 = vector.broadcast %cst_86 : f32 to vector<8x128xf32>
    %187 = arith.mulf %186, %185 : vector<8x128xf32>
    %cst_87 = arith.constant 5.000000e-01 : f32
    %188 = vector.broadcast %cst_87 : f32 to vector<8x128xf32>
    %189 = arith.addf %187, %188 : vector<8x128xf32>
    %190 = vector.extract_strided_slice %189 {offsets = [0, 0], sizes = [8, 32], strides = [1, 1]} : vector<8x128xf32> to vector<8x32xf32>
    %191 = vector.extract_strided_slice %189 {offsets = [0, 32], sizes = [8, 32], strides = [1, 1]} : vector<8x128xf32> to vector<8x32xf32>
    %192 = vector.extract_strided_slice %189 {offsets = [0, 96], sizes = [8, 32], strides = [1, 1]} : vector<8x128xf32> to vector<8x32xf32>
    %193 = vector.extract_strided_slice %182 {offsets = [0, 64], sizes = [8, 32], strides = [1, 1]} : vector<8x128xf32> to vector<8x32xf32>
    %194 = math.tanh %193 : vector<8x32xf32>
    %195 = arith.mulf %191, %170 : vector<8x32xf32>
    %196 = arith.mulf %190, %194 : vector<8x32xf32>
    %197 = arith.addf %195, %196 : vector<8x32xf32>
    %198 = math.tanh %197 : vector<8x32xf32>
    %199 = arith.mulf %192, %198 : vector<8x32xf32>
    %200 = arith.index_cast %176 : i32 to index
    %c0_88 = arith.constant 0 : index
    %201 = vector.load %arg13[%200, %c0_88] : memref<64x32xf32, #tpu.memory_space<vmem>>, vector<8x32xf32>
    tpu.vector_store %arg13[%200, %c0_88], %199 {strides = array<i32>} : memref<64x32xf32, #tpu.memory_space<vmem>>, vector<8x32xf32>,
    %c6_i32 = arith.constant 6 : i32
    %c8_i32_89 = arith.constant 8 : i32
    %202 = arith.muli %c6_i32, %c8_i32_89 : i32
    %203 = tpu.assume_multiple %202, 8 : i32
    %204 = arith.index_cast %203 : i32 to index
    %c0_90 = arith.constant 0 : index
    %205 = vector.load %arg14[%204, %c0_90] : memref<64x128xf32, #tpu.memory_space<vmem>>, vector<8x128xf32>
    %c0_91 = arith.constant 0 : index
    %c0_92 = arith.constant 0 : index
    %c0_93 = arith.constant 0 : index
    %206 = vector.load %arg8[%c0_91, %c0_92, %c0_93] : memref<2x32x128xf32, #tpu.memory_space<vmem>>, vector<1x32x128xf32>
    %207 = vector.shape_cast %206 : vector<1x32x128xf32> to vector<32x128xf32>
    %cst_94 = arith.constant dense<0.000000e+00> : vector<8x128xf32>
    %208 = tpu.matmul %199, %207, %cst_94 {dimension_numbers = #tpu.dot_dimension_numbers<[1], [0], [0], [1], [0, 0, 1, 1], [], []>} : vector<8x32xf32>, vector<32x128xf32>, vector<8x128xf32> -> vector<8x128xf32>
    %209 = arith.addf %205, %208 : vector<8x128xf32>
    %cst_95 = arith.constant 5.000000e-01 : f32
    %210 = vector.broadcast %cst_95 : f32 to vector<8x128xf32>
    %211 = arith.mulf %210, %209 : vector<8x128xf32>
    %212 = math.tanh %211 : vector<8x128xf32>
    %cst_96 = arith.constant 5.000000e-01 : f32
    %213 = vector.broadcast %cst_96 : f32 to vector<8x128xf32>
    %214 = arith.mulf %213, %212 : vector<8x128xf32>
    %cst_97 = arith.constant 5.000000e-01 : f32
    %215 = vector.broadcast %cst_97 : f32 to vector<8x128xf32>
    %216 = arith.addf %214, %215 : vector<8x128xf32>
    %217 = vector.extract_strided_slice %216 {offsets = [0, 0], sizes = [8, 32], strides = [1, 1]} : vector<8x128xf32> to vector<8x32xf32>
    %218 = vector.extract_strided_slice %216 {offsets = [0, 32], sizes = [8, 32], strides = [1, 1]} : vector<8x128xf32> to vector<8x32xf32>
    %219 = vector.extract_strided_slice %216 {offsets = [0, 96], sizes = [8, 32], strides = [1, 1]} : vector<8x128xf32> to vector<8x32xf32>
    %220 = vector.extract_strided_slice %209 {offsets = [0, 64], sizes = [8, 32], strides = [1, 1]} : vector<8x128xf32> to vector<8x32xf32>
    %221 = math.tanh %220 : vector<8x32xf32>
    %222 = arith.mulf %218, %197 : vector<8x32xf32>
    %223 = arith.mulf %217, %221 : vector<8x32xf32>
    %224 = arith.addf %222, %223 : vector<8x32xf32>
    %225 = math.tanh %224 : vector<8x32xf32>
    %226 = arith.mulf %219, %225 : vector<8x32xf32>
    %227 = arith.index_cast %203 : i32 to index
    %c0_98 = arith.constant 0 : index
    %228 = vector.load %arg13[%227, %c0_98] : memref<64x32xf32, #tpu.memory_space<vmem>>, vector<8x32xf32>
    tpu.vector_store %arg13[%227, %c0_98], %226 {strides = array<i32>} : memref<64x32xf32, #tpu.memory_space<vmem>>, vector<8x32xf32>,
    %c7_i32 = arith.constant 7 : i32
    %c8_i32_99 = arith.constant 8 : i32
    %229 = arith.muli %c7_i32, %c8_i32_99 : i32
    %230 = tpu.assume_multiple %229, 8 : i32
    %231 = arith.index_cast %230 : i32 to index
    %c0_100 = arith.constant 0 : index
    %232 = vector.load %arg14[%231, %c0_100] : memref<64x128xf32, #tpu.memory_space<vmem>>, vector<8x128xf32>
    %c0_101 = arith.constant 0 : index
    %c0_102 = arith.constant 0 : index
    %c0_103 = arith.constant 0 : index
    %233 = vector.load %arg8[%c0_101, %c0_102, %c0_103] : memref<2x32x128xf32, #tpu.memory_space<vmem>>, vector<1x32x128xf32>
    %234 = vector.shape_cast %233 : vector<1x32x128xf32> to vector<32x128xf32>
    %cst_104 = arith.constant dense<0.000000e+00> : vector<8x128xf32>
    %235 = tpu.matmul %226, %234, %cst_104 {dimension_numbers = #tpu.dot_dimension_numbers<[1], [0], [0], [1], [0, 0, 1, 1], [], []>} : vector<8x32xf32>, vector<32x128xf32>, vector<8x128xf32> -> vector<8x128xf32>
    %236 = arith.addf %232, %235 : vector<8x128xf32>
    %cst_105 = arith.constant 5.000000e-01 : f32
    %237 = vector.broadcast %cst_105 : f32 to vector<8x128xf32>
    %238 = arith.mulf %237, %236 : vector<8x128xf32>
    %239 = math.tanh %238 : vector<8x128xf32>
    %cst_106 = arith.constant 5.000000e-01 : f32
    %240 = vector.broadcast %cst_106 : f32 to vector<8x128xf32>
    %241 = arith.mulf %240, %239 : vector<8x128xf32>
    %cst_107 = arith.constant 5.000000e-01 : f32
    %242 = vector.broadcast %cst_107 : f32 to vector<8x128xf32>
    %243 = arith.addf %241, %242 : vector<8x128xf32>
    %244 = vector.extract_strided_slice %243 {offsets = [0, 0], sizes = [8, 32], strides = [1, 1]} : vector<8x128xf32> to vector<8x32xf32>
    %245 = vector.extract_strided_slice %243 {offsets = [0, 32], sizes = [8, 32], strides = [1, 1]} : vector<8x128xf32> to vector<8x32xf32>
    %246 = vector.extract_strided_slice %243 {offsets = [0, 96], sizes = [8, 32], strides = [1, 1]} : vector<8x128xf32> to vector<8x32xf32>
    %247 = vector.extract_strided_slice %236 {offsets = [0, 64], sizes = [8, 32], strides = [1, 1]} : vector<8x128xf32> to vector<8x32xf32>
    %248 = math.tanh %247 : vector<8x32xf32>
    %249 = arith.mulf %245, %224 : vector<8x32xf32>
    %250 = arith.mulf %244, %248 : vector<8x32xf32>
    %251 = arith.addf %249, %250 : vector<8x32xf32>
    %252 = math.tanh %251 : vector<8x32xf32>
    %253 = arith.mulf %246, %252 : vector<8x32xf32>
    %254 = arith.index_cast %230 : i32 to index
    %c0_108 = arith.constant 0 : index
    %255 = vector.load %arg13[%254, %c0_108] : memref<64x32xf32, #tpu.memory_space<vmem>>, vector<8x32xf32>
    tpu.vector_store %arg13[%254, %c0_108], %253 {strides = array<i32>} : memref<64x32xf32, #tpu.memory_space<vmem>>, vector<8x32xf32>,
    %c8_i32_109 = arith.constant 8 : i32
    %c0_110 = arith.constant 0 : index
    %c0_111 = arith.constant 0 : index
    %256 = vector.load %arg13[%c0_110, %c0_111] : memref<64x32xf32, #tpu.memory_space<vmem>>, vector<64x32xf32>
    %c1 = arith.constant 1 : index
    %c0_112 = arith.constant 0 : index
    %c0_113 = arith.constant 0 : index
    %257 = vector.load %arg7[%c1, %c0_112, %c0_113] : memref<2x32x128xf32, #tpu.memory_space<vmem>>, vector<1x32x128xf32>
    %258 = vector.shape_cast %257 : vector<1x32x128xf32> to vector<32x128xf32>
    %cst_114 = arith.constant dense<0.000000e+00> : vector<64x128xf32>
    %259 = tpu.matmul %256, %258, %cst_114 {dimension_numbers = #tpu.dot_dimension_numbers<[1], [0], [0], [1], [0, 0, 1, 1], [], []>} : vector<64x32xf32>, vector<32x128xf32>, vector<64x128xf32> -> vector<64x128xf32>
    %c1_115 = arith.constant 1 : index
    %c0_116 = arith.constant 0 : index
    %c0_117 = arith.constant 0 : index
    %260 = vector.load %arg9[%c1_115, %c0_116, %c0_117] : memref<2x1x128xf32, #tpu.memory_space<vmem>>, vector<1x1x128xf32>
    %261 = vector.shape_cast %260 : vector<1x1x128xf32> to vector<1x128xf32>
    %262 = vector.broadcast %261 : vector<1x128xf32> to vector<64x128xf32>
    %263 = arith.addf %259, %262 : vector<64x128xf32>
    %c0_118 = arith.constant 0 : index
    %c0_119 = arith.constant 0 : index
    %264 = vector.load %arg14[%c0_118, %c0_119] : memref<64x128xf32, #tpu.memory_space<vmem>>, vector<64x128xf32>
    tpu.vector_store %arg14[%c0_118, %c0_119], %263 {strides = array<i32>} : memref<64x128xf32, #tpu.memory_space<vmem>>, vector<64x128xf32>,
    %cst_120 = arith.constant 0.000000e+00 : f32
    %265 = vector.broadcast %cst_120 : f32 to vector<8x32xf32>
    %cst_121 = arith.constant 0.000000e+00 : f32
    %266 = vector.broadcast %cst_121 : f32 to vector<8x32xf32>
    %c0_i32_122 = arith.constant 0 : i32
    %c8_i32_123 = arith.constant 8 : i32
    %267 = arith.muli %c0_i32_122, %c8_i32_123 : i32
    %268 = tpu.assume_multiple %267, 8 : i32
    %269 = arith.index_cast %268 : i32 to index
    %c0_124 = arith.constant 0 : index
    %270 = vector.load %arg14[%269, %c0_124] : memref<64x128xf32, #tpu.memory_space<vmem>>, vector<8x128xf32>
    %c1_125 = arith.constant 1 : index
    %c0_126 = arith.constant 0 : index
    %c0_127 = arith.constant 0 : index
    %271 = vector.load %arg8[%c1_125, %c0_126, %c0_127] : memref<2x32x128xf32, #tpu.memory_space<vmem>>, vector<1x32x128xf32>
    %272 = vector.shape_cast %271 : vector<1x32x128xf32> to vector<32x128xf32>
    %cst_128 = arith.constant dense<0.000000e+00> : vector<8x128xf32>
    %273 = tpu.matmul %265, %272, %cst_128 {dimension_numbers = #tpu.dot_dimension_numbers<[1], [0], [0], [1], [0, 0, 1, 1], [], []>} : vector<8x32xf32>, vector<32x128xf32>, vector<8x128xf32> -> vector<8x128xf32>
    %274 = arith.addf %270, %273 : vector<8x128xf32>
    %cst_129 = arith.constant 5.000000e-01 : f32
    %275 = vector.broadcast %cst_129 : f32 to vector<8x128xf32>
    %276 = arith.mulf %275, %274 : vector<8x128xf32>
    %277 = math.tanh %276 : vector<8x128xf32>
    %cst_130 = arith.constant 5.000000e-01 : f32
    %278 = vector.broadcast %cst_130 : f32 to vector<8x128xf32>
    %279 = arith.mulf %278, %277 : vector<8x128xf32>
    %cst_131 = arith.constant 5.000000e-01 : f32
    %280 = vector.broadcast %cst_131 : f32 to vector<8x128xf32>
    %281 = arith.addf %279, %280 : vector<8x128xf32>
    %282 = vector.extract_strided_slice %281 {offsets = [0, 0], sizes = [8, 32], strides = [1, 1]} : vector<8x128xf32> to vector<8x32xf32>
    %283 = vector.extract_strided_slice %281 {offsets = [0, 32], sizes = [8, 32], strides = [1, 1]} : vector<8x128xf32> to vector<8x32xf32>
    %284 = vector.extract_strided_slice %281 {offsets = [0, 96], sizes = [8, 32], strides = [1, 1]} : vector<8x128xf32> to vector<8x32xf32>
    %285 = vector.extract_strided_slice %274 {offsets = [0, 64], sizes = [8, 32], strides = [1, 1]} : vector<8x128xf32> to vector<8x32xf32>
    %286 = math.tanh %285 : vector<8x32xf32>
    %287 = arith.mulf %283, %266 : vector<8x32xf32>
    %288 = arith.mulf %282, %286 : vector<8x32xf32>
    %289 = arith.addf %287, %288 : vector<8x32xf32>
    %290 = math.tanh %289 : vector<8x32xf32>
    %291 = arith.mulf %284, %290 : vector<8x32xf32>
    %292 = arith.index_cast %268 : i32 to index
    %c0_132 = arith.constant 0 : index
    %293 = vector.load %arg13[%292, %c0_132] : memref<64x32xf32, #tpu.memory_space<vmem>>, vector<8x32xf32>
    tpu.vector_store %arg13[%292, %c0_132], %291 {strides = array<i32>} : memref<64x32xf32, #tpu.memory_space<vmem>>, vector<8x32xf32>,
    %c1_i32_133 = arith.constant 1 : i32
    %c8_i32_134 = arith.constant 8 : i32
    %294 = arith.muli %c1_i32_133, %c8_i32_134 : i32
    %295 = tpu.assume_multiple %294, 8 : i32
    %296 = arith.index_cast %295 : i32 to index
    %c0_135 = arith.constant 0 : index
    %297 = vector.load %arg14[%296, %c0_135] : memref<64x128xf32, #tpu.memory_space<vmem>>, vector<8x128xf32>
    %c1_136 = arith.constant 1 : index
    %c0_137 = arith.constant 0 : index
    %c0_138 = arith.constant 0 : index
    %298 = vector.load %arg8[%c1_136, %c0_137, %c0_138] : memref<2x32x128xf32, #tpu.memory_space<vmem>>, vector<1x32x128xf32>
    %299 = vector.shape_cast %298 : vector<1x32x128xf32> to vector<32x128xf32>
    %cst_139 = arith.constant dense<0.000000e+00> : vector<8x128xf32>
    %300 = tpu.matmul %291, %299, %cst_139 {dimension_numbers = #tpu.dot_dimension_numbers<[1], [0], [0], [1], [0, 0, 1, 1], [], []>} : vector<8x32xf32>, vector<32x128xf32>, vector<8x128xf32> -> vector<8x128xf32>
    %301 = arith.addf %297, %300 : vector<8x128xf32>
    %cst_140 = arith.constant 5.000000e-01 : f32
    %302 = vector.broadcast %cst_140 : f32 to vector<8x128xf32>
    %303 = arith.mulf %302, %301 : vector<8x128xf32>
    %304 = math.tanh %303 : vector<8x128xf32>
    %cst_141 = arith.constant 5.000000e-01 : f32
    %305 = vector.broadcast %cst_141 : f32 to vector<8x128xf32>
    %306 = arith.mulf %305, %304 : vector<8x128xf32>
    %cst_142 = arith.constant 5.000000e-01 : f32
    %307 = vector.broadcast %cst_142 : f32 to vector<8x128xf32>
    %308 = arith.addf %306, %307 : vector<8x128xf32>
    %309 = vector.extract_strided_slice %308 {offsets = [0, 0], sizes = [8, 32], strides = [1, 1]} : vector<8x128xf32> to vector<8x32xf32>
    %310 = vector.extract_strided_slice %308 {offsets = [0, 32], sizes = [8, 32], strides = [1, 1]} : vector<8x128xf32> to vector<8x32xf32>
    %311 = vector.extract_strided_slice %308 {offsets = [0, 96], sizes = [8, 32], strides = [1, 1]} : vector<8x128xf32> to vector<8x32xf32>
    %312 = vector.extract_strided_slice %301 {offsets = [0, 64], sizes = [8, 32], strides = [1, 1]} : vector<8x128xf32> to vector<8x32xf32>
    %313 = math.tanh %312 : vector<8x32xf32>
    %314 = arith.mulf %310, %289 : vector<8x32xf32>
    %315 = arith.mulf %309, %313 : vector<8x32xf32>
    %316 = arith.addf %314, %315 : vector<8x32xf32>
    %317 = math.tanh %316 : vector<8x32xf32>
    %318 = arith.mulf %311, %317 : vector<8x32xf32>
    %319 = arith.index_cast %295 : i32 to index
    %c0_143 = arith.constant 0 : index
    %320 = vector.load %arg13[%319, %c0_143] : memref<64x32xf32, #tpu.memory_space<vmem>>, vector<8x32xf32>
    tpu.vector_store %arg13[%319, %c0_143], %318 {strides = array<i32>} : memref<64x32xf32, #tpu.memory_space<vmem>>, vector<8x32xf32>,
    %c2_i32_144 = arith.constant 2 : i32
    %c8_i32_145 = arith.constant 8 : i32
    %321 = arith.muli %c2_i32_144, %c8_i32_145 : i32
    %322 = tpu.assume_multiple %321, 8 : i32
    %323 = arith.index_cast %322 : i32 to index
    %c0_146 = arith.constant 0 : index
    %324 = vector.load %arg14[%323, %c0_146] : memref<64x128xf32, #tpu.memory_space<vmem>>, vector<8x128xf32>
    %c1_147 = arith.constant 1 : index
    %c0_148 = arith.constant 0 : index
    %c0_149 = arith.constant 0 : index
    %325 = vector.load %arg8[%c1_147, %c0_148, %c0_149] : memref<2x32x128xf32, #tpu.memory_space<vmem>>, vector<1x32x128xf32>
    %326 = vector.shape_cast %325 : vector<1x32x128xf32> to vector<32x128xf32>
    %cst_150 = arith.constant dense<0.000000e+00> : vector<8x128xf32>
    %327 = tpu.matmul %318, %326, %cst_150 {dimension_numbers = #tpu.dot_dimension_numbers<[1], [0], [0], [1], [0, 0, 1, 1], [], []>} : vector<8x32xf32>, vector<32x128xf32>, vector<8x128xf32> -> vector<8x128xf32>
    %328 = arith.addf %324, %327 : vector<8x128xf32>
    %cst_151 = arith.constant 5.000000e-01 : f32
    %329 = vector.broadcast %cst_151 : f32 to vector<8x128xf32>
    %330 = arith.mulf %329, %328 : vector<8x128xf32>
    %331 = math.tanh %330 : vector<8x128xf32>
    %cst_152 = arith.constant 5.000000e-01 : f32
    %332 = vector.broadcast %cst_152 : f32 to vector<8x128xf32>
    %333 = arith.mulf %332, %331 : vector<8x128xf32>
    %cst_153 = arith.constant 5.000000e-01 : f32
    %334 = vector.broadcast %cst_153 : f32 to vector<8x128xf32>
    %335 = arith.addf %333, %334 : vector<8x128xf32>
    %336 = vector.extract_strided_slice %335 {offsets = [0, 0], sizes = [8, 32], strides = [1, 1]} : vector<8x128xf32> to vector<8x32xf32>
    %337 = vector.extract_strided_slice %335 {offsets = [0, 32], sizes = [8, 32], strides = [1, 1]} : vector<8x128xf32> to vector<8x32xf32>
    %338 = vector.extract_strided_slice %335 {offsets = [0, 96], sizes = [8, 32], strides = [1, 1]} : vector<8x128xf32> to vector<8x32xf32>
    %339 = vector.extract_strided_slice %328 {offsets = [0, 64], sizes = [8, 32], strides = [1, 1]} : vector<8x128xf32> to vector<8x32xf32>
    %340 = math.tanh %339 : vector<8x32xf32>
    %341 = arith.mulf %337, %316 : vector<8x32xf32>
    %342 = arith.mulf %336, %340 : vector<8x32xf32>
    %343 = arith.addf %341, %342 : vector<8x32xf32>
    %344 = math.tanh %343 : vector<8x32xf32>
    %345 = arith.mulf %338, %344 : vector<8x32xf32>
    %346 = arith.index_cast %322 : i32 to index
    %c0_154 = arith.constant 0 : index
    %347 = vector.load %arg13[%346, %c0_154] : memref<64x32xf32, #tpu.memory_space<vmem>>, vector<8x32xf32>
    tpu.vector_store %arg13[%346, %c0_154], %345 {strides = array<i32>} : memref<64x32xf32, #tpu.memory_space<vmem>>, vector<8x32xf32>,
    %c3_i32_155 = arith.constant 3 : i32
    %c8_i32_156 = arith.constant 8 : i32
    %348 = arith.muli %c3_i32_155, %c8_i32_156 : i32
    %349 = tpu.assume_multiple %348, 8 : i32
    %350 = arith.index_cast %349 : i32 to index
    %c0_157 = arith.constant 0 : index
    %351 = vector.load %arg14[%350, %c0_157] : memref<64x128xf32, #tpu.memory_space<vmem>>, vector<8x128xf32>
    %c1_158 = arith.constant 1 : index
    %c0_159 = arith.constant 0 : index
    %c0_160 = arith.constant 0 : index
    %352 = vector.load %arg8[%c1_158, %c0_159, %c0_160] : memref<2x32x128xf32, #tpu.memory_space<vmem>>, vector<1x32x128xf32>
    %353 = vector.shape_cast %352 : vector<1x32x128xf32> to vector<32x128xf32>
    %cst_161 = arith.constant dense<0.000000e+00> : vector<8x128xf32>
    %354 = tpu.matmul %345, %353, %cst_161 {dimension_numbers = #tpu.dot_dimension_numbers<[1], [0], [0], [1], [0, 0, 1, 1], [], []>} : vector<8x32xf32>, vector<32x128xf32>, vector<8x128xf32> -> vector<8x128xf32>
    %355 = arith.addf %351, %354 : vector<8x128xf32>
    %cst_162 = arith.constant 5.000000e-01 : f32
    %356 = vector.broadcast %cst_162 : f32 to vector<8x128xf32>
    %357 = arith.mulf %356, %355 : vector<8x128xf32>
    %358 = math.tanh %357 : vector<8x128xf32>
    %cst_163 = arith.constant 5.000000e-01 : f32
    %359 = vector.broadcast %cst_163 : f32 to vector<8x128xf32>
    %360 = arith.mulf %359, %358 : vector<8x128xf32>
    %cst_164 = arith.constant 5.000000e-01 : f32
    %361 = vector.broadcast %cst_164 : f32 to vector<8x128xf32>
    %362 = arith.addf %360, %361 : vector<8x128xf32>
    %363 = vector.extract_strided_slice %362 {offsets = [0, 0], sizes = [8, 32], strides = [1, 1]} : vector<8x128xf32> to vector<8x32xf32>
    %364 = vector.extract_strided_slice %362 {offsets = [0, 32], sizes = [8, 32], strides = [1, 1]} : vector<8x128xf32> to vector<8x32xf32>
    %365 = vector.extract_strided_slice %362 {offsets = [0, 96], sizes = [8, 32], strides = [1, 1]} : vector<8x128xf32> to vector<8x32xf32>
    %366 = vector.extract_strided_slice %355 {offsets = [0, 64], sizes = [8, 32], strides = [1, 1]} : vector<8x128xf32> to vector<8x32xf32>
    %367 = math.tanh %366 : vector<8x32xf32>
    %368 = arith.mulf %364, %343 : vector<8x32xf32>
    %369 = arith.mulf %363, %367 : vector<8x32xf32>
    %370 = arith.addf %368, %369 : vector<8x32xf32>
    %371 = math.tanh %370 : vector<8x32xf32>
    %372 = arith.mulf %365, %371 : vector<8x32xf32>
    %373 = arith.index_cast %349 : i32 to index
    %c0_165 = arith.constant 0 : index
    %374 = vector.load %arg13[%373, %c0_165] : memref<64x32xf32, #tpu.memory_space<vmem>>, vector<8x32xf32>
    tpu.vector_store %arg13[%373, %c0_165], %372 {strides = array<i32>} : memref<64x32xf32, #tpu.memory_space<vmem>>, vector<8x32xf32>,
    %c4_i32_166 = arith.constant 4 : i32
    %c8_i32_167 = arith.constant 8 : i32
    %375 = arith.muli %c4_i32_166, %c8_i32_167 : i32
    %376 = tpu.assume_multiple %375, 8 : i32
    %377 = arith.index_cast %376 : i32 to index
    %c0_168 = arith.constant 0 : index
    %378 = vector.load %arg14[%377, %c0_168] : memref<64x128xf32, #tpu.memory_space<vmem>>, vector<8x128xf32>
    %c1_169 = arith.constant 1 : index
    %c0_170 = arith.constant 0 : index
    %c0_171 = arith.constant 0 : index
    %379 = vector.load %arg8[%c1_169, %c0_170, %c0_171] : memref<2x32x128xf32, #tpu.memory_space<vmem>>, vector<1x32x128xf32>
    %380 = vector.shape_cast %379 : vector<1x32x128xf32> to vector<32x128xf32>
    %cst_172 = arith.constant dense<0.000000e+00> : vector<8x128xf32>
    %381 = tpu.matmul %372, %380, %cst_172 {dimension_numbers = #tpu.dot_dimension_numbers<[1], [0], [0], [1], [0, 0, 1, 1], [], []>} : vector<8x32xf32>, vector<32x128xf32>, vector<8x128xf32> -> vector<8x128xf32>
    %382 = arith.addf %378, %381 : vector<8x128xf32>
    %cst_173 = arith.constant 5.000000e-01 : f32
    %383 = vector.broadcast %cst_173 : f32 to vector<8x128xf32>
    %384 = arith.mulf %383, %382 : vector<8x128xf32>
    %385 = math.tanh %384 : vector<8x128xf32>
    %cst_174 = arith.constant 5.000000e-01 : f32
    %386 = vector.broadcast %cst_174 : f32 to vector<8x128xf32>
    %387 = arith.mulf %386, %385 : vector<8x128xf32>
    %cst_175 = arith.constant 5.000000e-01 : f32
    %388 = vector.broadcast %cst_175 : f32 to vector<8x128xf32>
    %389 = arith.addf %387, %388 : vector<8x128xf32>
    %390 = vector.extract_strided_slice %389 {offsets = [0, 0], sizes = [8, 32], strides = [1, 1]} : vector<8x128xf32> to vector<8x32xf32>
    %391 = vector.extract_strided_slice %389 {offsets = [0, 32], sizes = [8, 32], strides = [1, 1]} : vector<8x128xf32> to vector<8x32xf32>
    %392 = vector.extract_strided_slice %389 {offsets = [0, 96], sizes = [8, 32], strides = [1, 1]} : vector<8x128xf32> to vector<8x32xf32>
    %393 = vector.extract_strided_slice %382 {offsets = [0, 64], sizes = [8, 32], strides = [1, 1]} : vector<8x128xf32> to vector<8x32xf32>
    %394 = math.tanh %393 : vector<8x32xf32>
    %395 = arith.mulf %391, %370 : vector<8x32xf32>
    %396 = arith.mulf %390, %394 : vector<8x32xf32>
    %397 = arith.addf %395, %396 : vector<8x32xf32>
    %398 = math.tanh %397 : vector<8x32xf32>
    %399 = arith.mulf %392, %398 : vector<8x32xf32>
    %400 = arith.index_cast %376 : i32 to index
    %c0_176 = arith.constant 0 : index
    %401 = vector.load %arg13[%400, %c0_176] : memref<64x32xf32, #tpu.memory_space<vmem>>, vector<8x32xf32>
    tpu.vector_store %arg13[%400, %c0_176], %399 {strides = array<i32>} : memref<64x32xf32, #tpu.memory_space<vmem>>, vector<8x32xf32>,
    %c5_i32_177 = arith.constant 5 : i32
    %c8_i32_178 = arith.constant 8 : i32
    %402 = arith.muli %c5_i32_177, %c8_i32_178 : i32
    %403 = tpu.assume_multiple %402, 8 : i32
    %404 = arith.index_cast %403 : i32 to index
    %c0_179 = arith.constant 0 : index
    %405 = vector.load %arg14[%404, %c0_179] : memref<64x128xf32, #tpu.memory_space<vmem>>, vector<8x128xf32>
    %c1_180 = arith.constant 1 : index
    %c0_181 = arith.constant 0 : index
    %c0_182 = arith.constant 0 : index
    %406 = vector.load %arg8[%c1_180, %c0_181, %c0_182] : memref<2x32x128xf32, #tpu.memory_space<vmem>>, vector<1x32x128xf32>
    %407 = vector.shape_cast %406 : vector<1x32x128xf32> to vector<32x128xf32>
    %cst_183 = arith.constant dense<0.000000e+00> : vector<8x128xf32>
    %408 = tpu.matmul %399, %407, %cst_183 {dimension_numbers = #tpu.dot_dimension_numbers<[1], [0], [0], [1], [0, 0, 1, 1], [], []>} : vector<8x32xf32>, vector<32x128xf32>, vector<8x128xf32> -> vector<8x128xf32>
    %409 = arith.addf %405, %408 : vector<8x128xf32>
    %cst_184 = arith.constant 5.000000e-01 : f32
    %410 = vector.broadcast %cst_184 : f32 to vector<8x128xf32>
    %411 = arith.mulf %410, %409 : vector<8x128xf32>
    %412 = math.tanh %411 : vector<8x128xf32>
    %cst_185 = arith.constant 5.000000e-01 : f32
    %413 = vector.broadcast %cst_185 : f32 to vector<8x128xf32>
    %414 = arith.mulf %413, %412 : vector<8x128xf32>
    %cst_186 = arith.constant 5.000000e-01 : f32
    %415 = vector.broadcast %cst_186 : f32 to vector<8x128xf32>
    %416 = arith.addf %414, %415 : vector<8x128xf32>
    %417 = vector.extract_strided_slice %416 {offsets = [0, 0], sizes = [8, 32], strides = [1, 1]} : vector<8x128xf32> to vector<8x32xf32>
    %418 = vector.extract_strided_slice %416 {offsets = [0, 32], sizes = [8, 32], strides = [1, 1]} : vector<8x128xf32> to vector<8x32xf32>
    %419 = vector.extract_strided_slice %416 {offsets = [0, 96], sizes = [8, 32], strides = [1, 1]} : vector<8x128xf32> to vector<8x32xf32>
    %420 = vector.extract_strided_slice %409 {offsets = [0, 64], sizes = [8, 32], strides = [1, 1]} : vector<8x128xf32> to vector<8x32xf32>
    %421 = math.tanh %420 : vector<8x32xf32>
    %422 = arith.mulf %418, %397 : vector<8x32xf32>
    %423 = arith.mulf %417, %421 : vector<8x32xf32>
    %424 = arith.addf %422, %423 : vector<8x32xf32>
    %425 = math.tanh %424 : vector<8x32xf32>
    %426 = arith.mulf %419, %425 : vector<8x32xf32>
    %427 = arith.index_cast %403 : i32 to index
    %c0_187 = arith.constant 0 : index
    %428 = vector.load %arg13[%427, %c0_187] : memref<64x32xf32, #tpu.memory_space<vmem>>, vector<8x32xf32>
    tpu.vector_store %arg13[%427, %c0_187], %426 {strides = array<i32>} : memref<64x32xf32, #tpu.memory_space<vmem>>, vector<8x32xf32>,
    %c6_i32_188 = arith.constant 6 : i32
    %c8_i32_189 = arith.constant 8 : i32
    %429 = arith.muli %c6_i32_188, %c8_i32_189 : i32
    %430 = tpu.assume_multiple %429, 8 : i32
    %431 = arith.index_cast %430 : i32 to index
    %c0_190 = arith.constant 0 : index
    %432 = vector.load %arg14[%431, %c0_190] : memref<64x128xf32, #tpu.memory_space<vmem>>, vector<8x128xf32>
    %c1_191 = arith.constant 1 : index
    %c0_192 = arith.constant 0 : index
    %c0_193 = arith.constant 0 : index
    %433 = vector.load %arg8[%c1_191, %c0_192, %c0_193] : memref<2x32x128xf32, #tpu.memory_space<vmem>>, vector<1x32x128xf32>
    %434 = vector.shape_cast %433 : vector<1x32x128xf32> to vector<32x128xf32>
    %cst_194 = arith.constant dense<0.000000e+00> : vector<8x128xf32>
    %435 = tpu.matmul %426, %434, %cst_194 {dimension_numbers = #tpu.dot_dimension_numbers<[1], [0], [0], [1], [0, 0, 1, 1], [], []>} : vector<8x32xf32>, vector<32x128xf32>, vector<8x128xf32> -> vector<8x128xf32>
    %436 = arith.addf %432, %435 : vector<8x128xf32>
    %cst_195 = arith.constant 5.000000e-01 : f32
    %437 = vector.broadcast %cst_195 : f32 to vector<8x128xf32>
    %438 = arith.mulf %437, %436 : vector<8x128xf32>
    %439 = math.tanh %438 : vector<8x128xf32>
    %cst_196 = arith.constant 5.000000e-01 : f32
    %440 = vector.broadcast %cst_196 : f32 to vector<8x128xf32>
    %441 = arith.mulf %440, %439 : vector<8x128xf32>
    %cst_197 = arith.constant 5.000000e-01 : f32
    %442 = vector.broadcast %cst_197 : f32 to vector<8x128xf32>
    %443 = arith.addf %441, %442 : vector<8x128xf32>
    %444 = vector.extract_strided_slice %443 {offsets = [0, 0], sizes = [8, 32], strides = [1, 1]} : vector<8x128xf32> to vector<8x32xf32>
    %445 = vector.extract_strided_slice %443 {offsets = [0, 32], sizes = [8, 32], strides = [1, 1]} : vector<8x128xf32> to vector<8x32xf32>
    %446 = vector.extract_strided_slice %443 {offsets = [0, 96], sizes = [8, 32], strides = [1, 1]} : vector<8x128xf32> to vector<8x32xf32>
    %447 = vector.extract_strided_slice %436 {offsets = [0, 64], sizes = [8, 32], strides = [1, 1]} : vector<8x128xf32> to vector<8x32xf32>
    %448 = math.tanh %447 : vector<8x32xf32>
    %449 = arith.mulf %445, %424 : vector<8x32xf32>
    %450 = arith.mulf %444, %448 : vector<8x32xf32>
    %451 = arith.addf %449, %450 : vector<8x32xf32>
    %452 = math.tanh %451 : vector<8x32xf32>
    %453 = arith.mulf %446, %452 : vector<8x32xf32>
    %454 = arith.index_cast %430 : i32 to index
    %c0_198 = arith.constant 0 : index
    %455 = vector.load %arg13[%454, %c0_198] : memref<64x32xf32, #tpu.memory_space<vmem>>, vector<8x32xf32>
    tpu.vector_store %arg13[%454, %c0_198], %453 {strides = array<i32>} : memref<64x32xf32, #tpu.memory_space<vmem>>, vector<8x32xf32>,
    %c7_i32_199 = arith.constant 7 : i32
    %c8_i32_200 = arith.constant 8 : i32
    %456 = arith.muli %c7_i32_199, %c8_i32_200 : i32
    %457 = tpu.assume_multiple %456, 8 : i32
    %458 = arith.index_cast %457 : i32 to index
    %c0_201 = arith.constant 0 : index
    %459 = vector.load %arg14[%458, %c0_201] : memref<64x128xf32, #tpu.memory_space<vmem>>, vector<8x128xf32>
    %c1_202 = arith.constant 1 : index
    %c0_203 = arith.constant 0 : index
    %c0_204 = arith.constant 0 : index
    %460 = vector.load %arg8[%c1_202, %c0_203, %c0_204] : memref<2x32x128xf32, #tpu.memory_space<vmem>>, vector<1x32x128xf32>
    %461 = vector.shape_cast %460 : vector<1x32x128xf32> to vector<32x128xf32>
    %cst_205 = arith.constant dense<0.000000e+00> : vector<8x128xf32>
    %462 = tpu.matmul %453, %461, %cst_205 {dimension_numbers = #tpu.dot_dimension_numbers<[1], [0], [0], [1], [0, 0, 1, 1], [], []>} : vector<8x32xf32>, vector<32x128xf32>, vector<8x128xf32> -> vector<8x128xf32>
    %463 = arith.addf %459, %462 : vector<8x128xf32>
    %cst_206 = arith.constant 5.000000e-01 : f32
    %464 = vector.broadcast %cst_206 : f32 to vector<8x128xf32>
    %465 = arith.mulf %464, %463 : vector<8x128xf32>
    %466 = math.tanh %465 : vector<8x128xf32>
    %cst_207 = arith.constant 5.000000e-01 : f32
    %467 = vector.broadcast %cst_207 : f32 to vector<8x128xf32>
    %468 = arith.mulf %467, %466 : vector<8x128xf32>
    %cst_208 = arith.constant 5.000000e-01 : f32
    %469 = vector.broadcast %cst_208 : f32 to vector<8x128xf32>
    %470 = arith.addf %468, %469 : vector<8x128xf32>
    %471 = vector.extract_strided_slice %470 {offsets = [0, 0], sizes = [8, 32], strides = [1, 1]} : vector<8x128xf32> to vector<8x32xf32>
    %472 = vector.extract_strided_slice %470 {offsets = [0, 32], sizes = [8, 32], strides = [1, 1]} : vector<8x128xf32> to vector<8x32xf32>
    %473 = vector.extract_strided_slice %470 {offsets = [0, 96], sizes = [8, 32], strides = [1, 1]} : vector<8x128xf32> to vector<8x32xf32>
    %474 = vector.extract_strided_slice %463 {offsets = [0, 64], sizes = [8, 32], strides = [1, 1]} : vector<8x128xf32> to vector<8x32xf32>
    %475 = math.tanh %474 : vector<8x32xf32>
    %476 = arith.mulf %472, %451 : vector<8x32xf32>
    %477 = arith.mulf %471, %475 : vector<8x32xf32>
    %478 = arith.addf %476, %477 : vector<8x32xf32>
    %479 = math.tanh %478 : vector<8x32xf32>
    %480 = arith.mulf %473, %479 : vector<8x32xf32>
    %481 = arith.index_cast %457 : i32 to index
    %c0_209 = arith.constant 0 : index
    %482 = vector.load %arg13[%481, %c0_209] : memref<64x32xf32, #tpu.memory_space<vmem>>, vector<8x32xf32>
    tpu.vector_store %arg13[%481, %c0_209], %480 {strides = array<i32>} : memref<64x32xf32, #tpu.memory_space<vmem>>, vector<8x32xf32>,
    %c8_i32_210 = arith.constant 8 : i32
    %c0_211 = arith.constant 0 : index
    %c0_212 = arith.constant 0 : index
    %483 = vector.load %arg13[%c0_211, %c0_212] : memref<64x32xf32, #tpu.memory_space<vmem>>, vector<64x32xf32>
    %c0_213 = arith.constant 0 : index
    %c0_214 = arith.constant 0 : index
    %484 = vector.load %arg10[%c0_213, %c0_214] : memref<32x2xf32, #tpu.memory_space<vmem>>, vector<32x2xf32>
    %cst_215 = arith.constant dense<0.000000e+00> : vector<64x2xf32>
    %485 = tpu.matmul %483, %484, %cst_215 {dimension_numbers = #tpu.dot_dimension_numbers<[1], [0], [0], [1], [0, 0, 1, 1], [], []>} : vector<64x32xf32>, vector<32x2xf32>, vector<64x2xf32> -> vector<64x2xf32>
    %c0_216 = arith.constant 0 : index
    %c0_217 = arith.constant 0 : index
    %486 = vector.load %arg11[%c0_216, %c0_217] : memref<1x2xf32, #tpu.memory_space<vmem>>, vector<1x2xf32>
    %487 = vector.broadcast %486 : vector<1x2xf32> to vector<64x2xf32>
    %488 = arith.addf %485, %487 : vector<64x2xf32>
    %c0_218 = arith.constant 0 : index
    %c0_219 = arith.constant 0 : index
    %489 = vector.load %arg2[%c0_218, %c0_219] : memref<64x2xf32, #tpu.memory_space<vmem>>, vector<64x2xf32>
    %490 = arith.mulf %488, %489 : vector<64x2xf32>
    %c0_220 = arith.constant 0 : index
    %c0_221 = arith.constant 0 : index
    %491 = vector.load %arg1[%c0_220, %c0_221] : memref<64x2xf32, #tpu.memory_space<vmem>>, vector<64x2xf32>
    %492 = arith.addf %490, %491 : vector<64x2xf32>
    %c0_222 = arith.constant 0 : index
    %c0_223 = arith.constant 0 : index
    %493 = vector.load %arg12[%c0_222, %c0_223] : memref<64x2xf32, #tpu.memory_space<vmem>>, vector<64x2xf32>
    tpu.vector_store %arg12[%c0_222, %c0_223], %492 {strides = array<i32>} : memref<64x2xf32, #tpu.memory_space<vmem>>, vector<64x2xf32>,
    return
  }
}

</mosaic_0001>

<bundles_post_ra>
// kernel: tpu_custom_call.1
= control target key start
LH: loop header
LB: loop body
LE: loop exit
PB: predicated region body
PF: predicated region fallthrough
CT: control target
= control target key end

     0   :  { %v3489_v0 = vmov 0   ;;  %vm122_vm0 = vcmask 1041408   ;;  %v3490_v6 = vmov 1   ;;  %vm380_vm1 = vcmask 1045504   ;;  %s3495_s28 = smov 64   ;;  %s3496_s29 = smov 32   ;;  %s4176_s3 = inlined_call_operand.vmem [shape: s32[64,2], index: 3, kind: input, shape index: {}]   ;;  %s4177_s5 = inlined_call_operand.vmem [shape: f32[2,32], index: 5, kind: input, shape index: {}]   ;;  %s4178_s2 = inlined_call_operand.vmem [shape: f32[64,2], index: 2, kind: input, shape index: {}]   ;;  %s4179_s4 = inlined_call_operand.vmem [shape: f32[14,32], index: 4, kind: input, shape index: {}]   ;;  %s4180_s0 = inlined_call_operand.vmem [shape: f32[64,2], index: 0, kind: input, shape index: {}]   ;;  %s4181_s1 = inlined_call_operand.vmem [shape: f32[64,2], index: 1, kind: input, shape index: {}]   ;;  %s4182_s7 = inlined_call_operand.vmem [shape: f32[2,32,128], index: 7, kind: input, shape index: {}]   ;;  %s4183_s8 = inlined_call_operand.vmem [shape: f32[2,32,128], index: 8, kind: input, shape index: {}]   ;;  %s4184_s6 = inlined_call_operand.vmem [shape: f32[1,32], index: 6, kind: input, shape index: {}]   ;;  %s4185_s9 = inlined_call_operand.vmem [shape: f32[2,1,128], index: 9, kind: input, shape index: {}]   ;;  %s4186_s10 = inlined_call_operand.vmem [shape: f32[32,2], index: 10, kind: input, shape index: {}]   ;;  %s4187_s11 = inlined_call_operand.vmem [shape: f32[1,2], index: 11, kind: input, shape index: {}]   ;;  %s4188_s12 = inlined_call_operand.vmem [shape: f32[64,2], index: 12, kind: output, shape index: {}]  }
   0x1   :  { %3374 = vset.pattern.permute.xlu1 %v3489_v0  ;;  %3372 = vset.pattern.permute.xlu0 %v3489_v0  ;;  %v232_v1 = vld [vmem:[%s4176_s3 + $0x8] sm:$0xff]  ;;  %v231_v2 = vld [vmem:[%s4176_s3] sm:$0xff]  ;;  %v67_v9 = vld [vmem:[%s4178_s2 + $0x10] sm:$0xff]  ;;  %vm3491_vm2 = vmmov 1   ;;  %vm97_vm4 = vcmask 15360   ;;  %v239_v63 = vlaneseq  ;;  %vm355_vm9 = vcmask 113664  }
   0x2   :  { %245 = vperm.xlu1 %3374, %v232_v1   ;;  %242 = vperm.xlu0 %3372, %v231_v2   ;;  %v89_v3 = vld [vmem:[%s4177_s5] sm:$0x3]  ;;  %v66_v5 = vld [vmem:[%s4178_s2 + $0x8] sm:$0xff]  ;;  %vm3586_vm3 = vmpackc.low %vm380_vm1, %vm3491_vm2 }
   0x3   :  { %2954 = vmatprep.subr.msk.mxu0 %vm122_vm0, %v89_v3  ;;  %v65_v4 = vld [vmem:[%s4178_s2] sm:$0xff]  ;;  %3346 = vmatprep.subr.msk.mxu1 %vm122_vm0, %v89_v3  ;;  %v354_v8 = vld [vmem:[%s4179_s4 + $0x8] sm:$0x3f]  ;;  %v68_v12 = vld [vmem:[%s4178_s2 + $0x18] sm:$0xff] }
   0x4   :  { %2955 = vmatpush3.msk.msra.mxu0 %vm122_vm0, %v89_v3  ;;  %3377 = vrcp.f32 %v65_v4  ;;  %3347 = vmatpush3.msk.msra.mxu1 %vm122_vm0, %v89_v3  ;;  %v353_v7 = vld [vmem:[%s4179_s4] sm:$0xff]  ;;  %v233_v13 = vld [vmem:[%s4176_s3 + $0x10] sm:$0xff]  ;;  %v42_v16 = vld [vmem:[%s4180_s0 + $0x8] sm:$0xff] }
   0x5   :  { %3379 = vrcp.f32 %v66_v5  ;;  %v3220_v10 = vpack.c.bf16 %v354_v8, %v353_v7  ;;  %v41_v14 = vld [vmem:[%s4180_s0] sm:$0xff]  ;;  %v50_v17 = vld [vmem:[%s4181_s1 + $0x8] sm:$0xff]  ;;  %v234_v18 = vld [vmem:[%s4176_s3 + $0x18] sm:$0xff]  ;;  %v3492_v5 = vmov 0.0  }
   0x6   :  { %3375 = vset.pattern.permute.xlu1 %v3490_v6  ;;  %3373 = vset.pattern.permute.xlu0 %v3490_v6  ;;  %3381 = vrcp.f32 %v67_v9  ;;  %v49_v15 = vld [vmem:[%s4181_s1] sm:$0xff]  ;;  %v43_v21 = vld [vmem:[%s4180_s0 + $0x10] sm:$0xff]  ;;  %v70_v23 = vld [vmem:[%s4178_s2 + $0x28] sm:$0xff]  ;;  %v58_v24 = vsub.f32 %v42_v16, %v50_v17 }
   0x7   :  { %301 = vperm.xlu1 %3375, %v232_v1   ;;  %298 = vperm.xlu0 %3373, %v231_v2   ;;  %3383 = vrcp.f32 %v68_v12  ;;  %v69_v19 = vld [vmem:[%s4178_s2 + $0x20] sm:$0xff]  ;;  %v57_v20 = vsub.f32 %v41_v14, %v49_v15  ;;  %v51_v22 = vld [vmem:[%s4181_s1 + $0x10] sm:$0xff]  ;;  %v44_v25 = vld [vmem:[%s4180_s0 + $0x18] sm:$0xff] }
   0x8   :  { %3222 = vmatprep.subr.msk.bf16.mxu0 %vm3586_vm3, %v3220_v10  ;;  %3385 = vrcp.f32 %v69_v19  ;;  %v52_v26 = vld [vmem:[%s4181_s1 + $0x18] sm:$0xff]  ;;  %v59_v27 = vsub.f32 %v43_v21, %v51_v22  ;;  %v235_v31 = vld [vmem:[%s4176_s3 + $0x20] sm:$0xff]  ;;  %v71_v37 = vld [vmem:[%s4178_s2 + $0x30] sm:$0xff] }
   0x9   :  { %3387 = vrcp.f32 %v70_v23  ;;  %v60_v29 = vsub.f32 %v44_v25, %v52_v26  ;;  %v72_v39 = vld [vmem:[%s4178_s2 + $0x38] sm:$0xff]  ;;  %v236_v40 = vld [vmem:[%s4176_s3 + $0x28] sm:$0xff]  ;;  %v45_v41 = vld [vmem:[%s4180_s0 + $0x20] sm:$0xff] }
   0xa   :  { %3389 = vrcp.f32 %v71_v37  ;;  %v53_v42 = vld [vmem:[%s4181_s1 + $0x20] sm:$0xff]  ;;  %v46_v44 = vld [vmem:[%s4180_s0 + $0x28] sm:$0xff]  ;;  %v237_v50 = vld [vmem:[%s4176_s3 + $0x30] sm:$0xff] }
   0xb   :  { %3376 = vset.pattern.permute.xlu1 %v3489_v0  ;;  %304 = vperm.xlu0 %3373, %v233_v13   ;;  %3391 = vrcp.f32 %v72_v39  ;;  %v61_v43 = vsub.f32 %v45_v41, %v53_v42  ;;  %v54_v45 = vld [vmem:[%s4181_s1 + $0x28] sm:$0xff]  ;;  %v47_v52 = vld [vmem:[%s4180_s0 + $0x30] sm:$0xff]  ;;  %v238_v54 = vld [vmem:[%s4176_s3 + $0x38] sm:$0xff]  ;;  %v3683_v0 = vand.u32 127, %v239_v63 }
   0xc   :  { %248 = vperm.xlu1 %3376, %v233_v13   ;;  %v62_v47 = vsub.f32 %v46_v44, %v54_v45  ;;  %v55_v53 = vld [vmem:[%s4181_s1 + $0x30] sm:$0xff]  ;;  %v48_v56 = vld [vmem:[%s4180_s0 + $0x38] sm:$0xff]  ;;  %v514_v42 = vld [vmem:[%s4182_s7] sm:$0xff] }
   0xd   :  { %v63_v55 = vsub.f32 %v47_v52, %v55_v53  ;;  %v56_v57 = vld [vmem:[%s4181_s1 + $0x38] sm:$0xff]  ;;  %v516_v45 = vld [vmem:[%s4182_s7 + $0x10] sm:$0xff] }
   0xe   :  { %v3378_v28 = vpop.eup %3377  ;;  %v64_v59 = vsub.f32 %v48_v56, %v56_v57  ;;  %v664_v56 = vld [vmem:[%s4183_s8 + $0x8] sm:$0xff] }
   0xf   :  { %307 = vperm.xlu0 %3373, %v234_v18   ;;  %v3380_v30 = vpop.eup %3379  ;;  %v74_v32 = vmul.f32 %v3378_v28, %v57_v20 }
  0x10   :  { %251 = vperm.xlu1 %3376, %v234_v18   ;;  %v3382_v33 = vpop.eup %3381  ;;  %v76_v34 = vmul.f32 %v3380_v30, %v58_v24 }
  0x11   :  { %v3384_v35 = vpop.eup %3383  ;;  %2956 = vmatprep.mubr.msk.f32.mxu0 %vm97_vm4, %v74_v32  ;;  %v78_v36 = vmul.f32 %v3382_v33, %v59_v27 }
  0x12   :  { %2957 = vmatmul.mubr.msk.f32.vlgmr.msra.gmra.mrb[0].mxu0 %vm97_vm4, %v76_v34  ;;  %v80_v38 = vmul.f32 %v3384_v35, %v60_v29  ;;  %v3386_v46 = vpop.eup %3385 }
  0x13   :  { %310 = vperm.xlu0 %3373, %v235_v31   ;;  %3225 = vmatpush3.bf16.msk.msra.mxu0 %vm3586_vm3, %v3220_v10  ;;  %v3388_v48 = vpop.eup %3387  ;;  %v82_v49 = vmul.f32 %v3386_v46, %v61_v43  ;;  %v515_v43 = vld [vmem:[%s4182_s7 + $0x8] sm:$0xff]  ;;  %v517_v46 = vld [vmem:[%s4182_s7 + $0x18] sm:$0xff] }
  0x14   :  { %254 = vperm.xlu1 %3376, %v235_v31   ;;  %2959 = vmatprep.mubr.msk.f32.mxu1 %vm97_vm4, %v78_v36  ;;  %v84_v51 = vmul.f32 %v3388_v48, %v62_v47  ;;  %v3390_v58 = vpop.eup %3389  ;;  %v3226_v44 = vpack.c.bf16 %v515_v43, %v514_v42  ;;  %v3230_v47 = vpack.c.bf16 %v517_v46, %v516_v45 }
  0x15   :  { %2960 = vmatmul.mubr.msk.f32.vlgmr.msra.gmra.mrb[0].mxu1 %vm97_vm4, %v80_v38  ;;  %v3392_v60 = vpop.eup %3391  ;;  %v86_v61 = vmul.f32 %v3390_v58, %v63_v55  ;;  %v663_v55 = vld [vmem:[%s4183_s8] sm:$0xff]  ;;  %v665_v58 = vld [vmem:[%s4183_s8 + $0x10] sm:$0xff] }
  0x16   :  { %2962 = vmatprep.mubr.msk.f32.mxu1 %vm97_vm4, %v82_v49  ;;  %v88_v62 = vmul.f32 %v3392_v60, %v64_v59  ;;  %3227 = vmatprep.subr.bf16.mxu1 %v3226_v44  ;;  %v3745_v57 = vpack.c.bf16 %v664_v56, %v663_v55  ;;  %v666_v59 = vld [vmem:[%s4183_s8 + $0x18] sm:$0xff] }
  0x17   :  { %313 = vperm.xlu0 %3373, %v236_v40   ;;  %3229 = vmatpush3.bf16.msra.mxu1 %v3226_v44  ;;  %v3755_v60 = vpack.c.bf16 %v666_v59, %v665_v58 }
  0x18   :  { %257 = vperm.xlu1 %3376, %v236_v40   ;;  %3231 = vmatprep.subr.bf16.mxu1 %v3230_v47 }
  0x19   :  { %2963 = vmatmul.mubr.msk.f32.gmra.mrb[2].mxu1 %vm97_vm4, %v84_v51 }
  0x1a   :  { %2965 = vmatprep.mubr.msk.f32.mxu1 %vm97_vm4, %v86_v61  ;;  %v2706_v61 = vld [vmem:[%s4184_s6] ss:$0 sm:$0xff] }
  0x1b   :  { %316 = vperm.xlu0 %3373, %v237_v50   ;;  %3233 = vmatpush3.bf16.msra.mxu1 %v3230_v47 }
  0x1c   :  { %260 = vperm.xlu1 %3376, %v237_v50  }
  0x1d   :  { %2966 = vmatmul.mubr.msk.f32.gmra.mrb[4].mxu1 %vm97_vm4, %v88_v62 }
  0x1f   :  { %319 = vperm.xlu0 %3373, %v238_v54  }
  0x20   :  { %263 = vperm.xlu1 %3376, %v238_v54   ;;  %v3493_v54 = vmov 0.0|0.0  }
  0x21   :  { %3234 = vmatprep.subr.bf16.mxu1 %v3493_v54  ;;  %3246 = vmatprep.subr.bf16.mxu0 %v3493_v54 }
  0x81   :  { %v246_v1 = vpop.permute.xlu1 %245  ;;  %v243_v2 = vpop.permute.xlu0 %242 }
  0x82   :  { %vm266_vm5 = vcmp.eq.s32.totalorder %v246_v1, %v3683_v0  ;;  %vm265_vm6 = vcmp.eq.s32.totalorder %v243_v2, %v3683_v0 }
  0x83   :  { %v2717_v6 = vsel %vm266_vm5, 1.0, %v3492_v5  ;;  %v2716_v7 = vsel %vm265_vm6, 1.0, %v3492_v5 }
  0x86   :  { %v302_v3 = vpop.permute.xlu1 %301  ;;  %v299_v4 = vpop.permute.xlu0 %298 }
  0x87   :  { %vm322_vm7 = vcmp.eq.s32.totalorder %v302_v3, %v3683_v0  ;;  %vm321_vm8 = vcmp.eq.s32.totalorder %v299_v4, %v3683_v0 }
  0x88   :  { %v2725_v8 = vsel %vm322_vm7, 1.0, %v3492_v5  ;;  %v2724_v9 = vsel %vm321_vm8, 1.0, %v3492_v5  ;;  %vm3494_vm7 = vmmov 0   ;;  %vm497_vm8 = vcmask 261120  }
  0x89   :  { %v346_v10 = vadd.f32 %v2725_v8, %v2717_v6  ;;  %v345_v11 = vadd.f32 %v2724_v9, %v2716_v7 }
  0x8a   :  { %v305_v12 = vpop.permute.xlu0 %304 }
  0x8b   :  { %vm323_vm10 = vcmp.eq.s32.totalorder %v305_v12, %v3683_v0  ;;  %v249_v13 = vpop.permute.xlu1 %248  ;;  %2972 = vmatprep.mubr.msk.f32.mxu0 %vm355_vm9, %v345_v11 }
  0x8c   :  { %v2726_v14 = vsel %vm323_vm10, 1.0, %v3492_v5  ;;  %vm267_vm11 = vcmp.eq.s32.totalorder %v249_v13, %v3683_v0  ;;  %2973 = vmatmul.mubr.msk.f32.vlgmr.msra.gmra.mrb[0].mxu0 %vm355_vm9, %v346_v10 }
  0x8d   :  { %v2718_v15 = vsel %vm267_vm11, 1.0, %v3492_v5  ;;  %3248 = vmatpush3.bf16.msra.mxu0 %v3745_v57 }
  0x8e   :  { %v347_v16 = vadd.f32 %v2726_v14, %v2718_v15  ;;  %v308_v17 = vpop.permute.xlu0 %307  ;;  %3249 = vmatprep.subr.bf16.mxu0 %v3493_v54 }
  0x8f   :  { %vm324_vm12 = vcmp.eq.s32.totalorder %v308_v17, %v3683_v0  ;;  %v252_v18 = vpop.permute.xlu1 %251 }
  0x90   :  { %v2727_v19 = vsel %vm324_vm12, 1.0, %v3492_v5  ;;  %vm268_vm13 = vcmp.eq.s32.totalorder %v252_v18, %v3683_v0  ;;  %2975 = vmatprep.mubr.msk.f32.mxu0 %vm355_vm9, %v347_v16 }
  0x91   :  { %v2719_v20 = vsel %vm268_vm13, 1.0, %v3492_v5  ;;  %3251 = vmatpush3.bf16.msra.mxu0 %v3755_v60 }
  0x92   :  { %v348_v21 = vadd.f32 %v2727_v19, %v2719_v20  ;;  %v311_v22 = vpop.permute.xlu0 %310  ;;  %3258 = vmatprep.subr.bf16.mxu0 %v3493_v54 }
  0x93   :  { %vm325_vm14 = vcmp.eq.s32.totalorder %v311_v22, %v3683_v0  ;;  %v255_v23 = vpop.permute.xlu1 %254 }
  0x94   :  { %v2728_v24 = vsel %vm325_vm14, 1.0, %v3492_v5  ;;  %vm269_vm15 = vcmp.eq.s32.totalorder %v255_v23, %v3683_v0  ;;  %2976 = vmatmul.mubr.msk.f32.gmra.mrb[2].mxu0 %vm355_vm9, %v348_v21 }
  0x95   :  { %v2720_v25 = vsel %vm269_vm15, 1.0, %v3492_v5 }
  0x96   :  { %v349_v26 = vadd.f32 %v2728_v24, %v2720_v25  ;;  %v314_v27 = vpop.permute.xlu0 %313 }
  0x97   :  { %vm326_vm0 = vcmp.eq.s32.totalorder %v314_v27, %v3683_v0  ;;  %v258_v28 = vpop.permute.xlu1 %257 }
  0x98   :  { %v2729_v29 = vsel %vm326_vm0, 1.0, %v3492_v5  ;;  %vm270_vm1 = vcmp.eq.s32.totalorder %v258_v28, %v3683_v0  ;;  %2978 = vmatprep.mubr.msk.f32.mxu0 %vm355_vm9, %v349_v26 }
  0x99   :  { %v2721_v30 = vsel %vm270_vm1, 1.0, %v3492_v5 }
  0x9a   :  { %v350_v31 = vadd.f32 %v2729_v29, %v2721_v30  ;;  %v317_v32 = vpop.permute.xlu0 %316  ;;  %v2741_v29 = vld [vmem:[%s4185_s9] ss:$0 sm:$0xff] }
  0x9b   :  { %vm327_vm2 = vcmp.eq.s32.totalorder %v317_v32, %v3683_v0  ;;  %v261_v33 = vpop.permute.xlu1 %260 }
  0x9c   :  { %v2730_v34 = vsel %vm327_vm2, 1.0, %v3492_v5  ;;  %vm271_vm3 = vcmp.eq.s32.totalorder %v261_v33, %v3683_v0  ;;  %2979 = vmatmul.mubr.msk.f32.gmra.mrb[4].mxu0 %vm355_vm9, %v350_v31 }
  0x9d   :  { %v2722_v35 = vsel %vm271_vm3, 1.0, %v3492_v5 }
  0x9e   :  { %v351_v36 = vadd.f32 %v2730_v34, %v2722_v35  ;;  %v320_v37 = vpop.permute.xlu0 %319 }
  0x9f   :  { %vm328_vm5 = vcmp.eq.s32.totalorder %v320_v37, %v3683_v0  ;;  %v264_v38 = vpop.permute.xlu1 %263 }
  0xa0   :  { %v2731_v39 = vsel %vm328_vm5, 1.0, %v3492_v5  ;;  %vm272_vm6 = vcmp.eq.s32.totalorder %v264_v38, %v3683_v0  ;;  %2981 = vmatprep.mubr.msk.f32.mxu0 %vm355_vm9, %v351_v36 }
  0xa1   :  { %v2723_v40 = vsel %vm272_vm6, 1.0, %v3492_v5 }
  0xa2   :  { %v352_v41 = vadd.f32 %v2731_v39, %v2723_v40 }
  0xa4   :  { %2982 = vmatmul.mubr.msk.f32.gmra.mrb[6].mxu0 %vm355_vm9, %v352_v41 }
  0xa5   :  { %3034 = vmatprep.mubr.msk.f32.mxu0 %vm3494_vm7, %v3492_v5 }
  0xe8   :  { %v2961_v48 = vpop.f32.mrb[0].mxu1 }
  0xe9   :  { %v202_v49 = vpop.f32.mrb[1].mxu1  ;;  %v208_v2 = vadd.f32 %v2961_v48, %v2706_v61 }
  0xea   :  { %v203_v3 = vadd.f32 %v2706_v61, %v202_v49 }
  0xec   :  { %v2964_v50 = vpop.f32.mrb[2].mxu1 }
  0xed   :  { %v212_v51 = vpop.f32.mrb[3].mxu1  ;;  %v218_v11 = vadd.f32 %v2964_v50, %v2706_v61 }
  0xee   :  { %v213_v12 = vadd.f32 %v2706_v61, %v212_v51 }
  0xf0   :  { %v2967_v52 = vpop.f32.mrb[4].mxu1 }
  0xf1   :  { %v222_v53 = vpop.f32.mrb[5].mxu1  ;;  %v228_v19 = vadd.f32 %v2967_v52, %v2706_v61 }
  0xf2   :  { %v223_v20 = vadd.f32 %v2706_v61, %v222_v53 }
 0x15f   :  { %v2974_v62 = vpop.f32.mrb[0].mxu0 }
 0x160   :  { %v3348_v63 = vadd.f32 %v2974_v62, %v2706_v61  ;;  %v450_v0 = vpop.f32.mrb[1].mxu0 }
 0x161   :  { %v3349_v1 = vadd.f32 %v2706_v61, %v450_v0 }
 0x162   :  { %499 = vst.msk [vmem:[#allocation2 + $0x8] sm:$0xff] %vm497_vm8, %v3348_v63 }
 0x163   :  { %498 = vst.msk [vmem:[#allocation2] sm:$0xff] %vm497_vm8, %v3349_v1 }
 0x167   :  { %v2977_v4 = vpop.f32.mrb[2].mxu0 }
 0x168   :  { %v492_v6 = vadd.f32 %v2977_v4, %v208_v2  ;;  %v460_v7 = vpop.f32.mrb[3].mxu0 }
 0x169   :  { %v491_v8 = vadd.f32 %v460_v7, %v203_v3  ;;  %v507_v10 = vld [vmem:[#allocation2 + $0x8] sm:$0xff] }
 0x16a   :  { %501 = vst.msk [vmem:[#allocation2 + $0x18] sm:$0xff] %vm497_vm8, %v492_v6  ;;  %v506_v9 = vld [vmem:[#allocation2] sm:$0xff] }
 0x16b   :  { %500 = vst.msk [vmem:[#allocation2 + $0x10] sm:$0xff] %vm497_vm8, %v491_v8  ;;  %2992 = vmatprep.mubr.msk.f32.mxu1 %vm497_vm8, %v506_v9 }
 0x16c   :  { %2993 = vmatmul.mubr.msk.f32.vlgmr.msra.gmra.mrb[6].mxu1 %vm497_vm8, %v507_v10 }
 0x16d   :  { %3236 = vmatpush3.bf16.msra.mxu1 %v3745_v57 }
 0x16e   :  { %3237 = vmatprep.subr.bf16.mxu1 %v3493_v54 }
 0x16f   :  { %v2980_v13 = vpop.f32.mrb[4].mxu0 }
 0x170   :  { %v494_v14 = vadd.f32 %v2980_v13, %v218_v11  ;;  %v470_v15 = vpop.f32.mrb[5].mxu0 }
 0x171   :  { %v493_v16 = vadd.f32 %v470_v15, %v213_v12  ;;  %3239 = vmatpush3.bf16.msra.mxu1 %v3755_v60  ;;  %v509_v18 = vld [vmem:[#allocation2 + $0x18] sm:$0xff] }
 0x172   :  { %503 = vst.msk [vmem:[#allocation2 + $0x28] sm:$0xff] %vm497_vm8, %v494_v14  ;;  %v508_v17 = vld [vmem:[#allocation2 + $0x10] sm:$0xff]  ;;  %3240 = vmatprep.subr.bf16.mxu1 %v3493_v54 }
 0x173   :  { %502 = vst.msk [vmem:[#allocation2 + $0x20] sm:$0xff] %vm497_vm8, %v493_v16  ;;  %2995 = vmatprep.mubr.msk.f32.mxu1 %vm497_vm8, %v508_v17 }
 0x174   :  { %2996 = vmatmul.mubr.msk.f32.gmra.mrb[8].mxu1 %vm497_vm8, %v509_v18 }
 0x177   :  { %v2983_v21 = vpop.f32.mrb[6].mxu0 }
 0x178   :  { %v496_v22 = vadd.f32 %v2983_v21, %v228_v19  ;;  %v480_v23 = vpop.f32.mrb[7].mxu0 }
 0x179   :  { %v495_v24 = vadd.f32 %v480_v23, %v223_v20  ;;  %v511_v26 = vld [vmem:[#allocation2 + $0x28] sm:$0xff] }
 0x17a   :  { %505 = vst.msk [vmem:[#allocation2 + $0x38] sm:$0xff] %vm497_vm8, %v496_v22  ;;  %v510_v25 = vld [vmem:[#allocation2 + $0x20] sm:$0xff] }
 0x17b   :  { %504 = vst.msk [vmem:[#allocation2 + $0x30] sm:$0xff] %vm497_vm8, %v495_v24  ;;  %2998 = vmatprep.mubr.msk.f32.mxu1 %vm497_vm8, %v510_v25 }
 0x17c   :  { %2999 = vmatmul.mubr.msk.f32.gmra.mrb[10].mxu1 %vm497_vm8, %v511_v26 }
 0x181   :  { %v513_v28 = vld [vmem:[#allocation2 + $0x38] sm:$0xff] }
 0x182   :  { %v512_v27 = vld [vmem:[#allocation2 + $0x30] sm:$0xff] }
 0x183   :  { %3001 = vmatprep.mubr.msk.f32.mxu1 %vm497_vm8, %v512_v27 }
 0x184   :  { %3002 = vmatmul.mubr.msk.f32.gmra.mrb[12].mxu1 %vm497_vm8, %v513_v28 }
 0x185   :  { %3012 = vmatprep.mubr.msk.f32.mxu1 %vm3494_vm7, %v3492_v5 }
 0x188   :  { %3013 = vmatmul.mubr.f32.vlgmr.msra.gmra.mrb[14].mxu1 %v3492_v5 }
 0x189   :  { %3242 = vmatpush3.bf16.msra.mxu1 %v3745_v57  ;;  %3023 = vmatprep.mubr.msk.f32.mxu1 %vm3494_vm7, %v3492_v5 }
 0x18a   :  { %3243 = vmatprep.subr.bf16.mxu1 %v3493_v54 }
 0x18d   :  { %3245 = vmatpush3.bf16.msra.mxu1 %v3755_v60 }
 0x18e   :  { %3252 = vmatprep.subr.bf16.mxu1 %v3493_v54 }
 0x23f   :  { %v2994_v30 = vpop.f32.mrb[6].mxu1 }
 0x240   :  { %v621_v31 = vadd.f32 %v2994_v30, %v2741_v29  ;;  %v615_v32 = vpop.f32.mrb[7].mxu1 }
 0x241   :  { %v616_v45 = vadd.f32 %v2741_v29, %v615_v32 }
 0x247   :  { %v2997_v33 = vpop.f32.mrb[8].mxu1 }
 0x248   :  { %v3796_v34 = vadd.f32 %v2997_v33, %v2741_v29  ;;  %v625_v35 = vpop.f32.mrb[9].mxu1 }
 0x249   :  { %v3798_v36 = vadd.f32 %v2741_v29, %v625_v35 }
 0x24f   :  { %v3000_v37 = vpop.f32.mrb[10].mxu1 }
 0x250   :  { %v3800_v38 = vadd.f32 %v3000_v37, %v2741_v29  ;;  %v635_v39 = vpop.f32.mrb[11].mxu1 }
 0x251   :  { %v3802_v40 = vadd.f32 %v2741_v29, %v635_v39 }
 0x257   :  { %v3003_v41 = vpop.f32.mrb[12].mxu1 }
 0x258   :  { %v3804_v42 = vadd.f32 %v3003_v41, %v2741_v29  ;;  %v645_v43 = vpop.f32.mrb[13].mxu1 }
 0x259   :  { %v3806_v44 = vadd.f32 %v2741_v29, %v645_v43 }
 0x25b   :  { %v736_v46 = vpop.f32.mrb[14].mxu1 }
 0x25c   :  { %v740_v47 = vadd.f32 %v736_v46, %v616_v45  ;;  %v3014_v48 = vpop.f32.mrb[15].mxu1 }
 0x25e   :  { %3393 = vtanh.f32 %v740_v47  ;;  %v741_v50 = vmul.f32 0.5, %v740_v47 }
 0x260   :  { %3395 = vtanh.f32 %v741_v50 }
 0x268   :  { %v3394_v49 = vpop.eup %3393 }
 0x269   :  { %748 = vrot.lane.b32.xlu1 %v3394_v49, %s3495_s28 }
 0x26a   :  { %v3396_v51 = vpop.eup %3395 }
 0x26b   :  { %v743_v52 = vmul.f32 0.5, %v3396_v51 }
 0x26d   :  { %v744_v53 = vadd.f32 0.5, %v743_v52 }
 0x26f   :  { %v746_v58 = vmul.f32 0.0, %v744_v53 }
 0x2db   :  { %v749_v55 = vpop.permute.xlu1 %748 }
 0x2dc   :  { %v751_v56 = vmul.f32 %v749_v55, %v744_v53 }
 0x2de   :  { %753 = vrot.lane.b32.xlu0 %v751_v56, %s3496_s29 }
 0x350   :  { %v754_v59 = vpop.permute.xlu0 %753 }
 0x351   :  { %v756_v61 = vadd.f32 %v754_v59, %v746_v58 }
 0x353   :  { %3397 = vtanh.f32 %v756_v61 }
 0x35d   :  { %v3398_v62 = vpop.eup %3397 }
 0x35e   :  { %759 = vrot.lane.b32.xlu1 %v3398_v62, %s3495_s28 }
 0x3d0   :  { %v760_v63 = vpop.permute.xlu1 %759 }
 0x3d1   :  { %v762_v0 = vmul.f32 %v760_v63, %v744_v53 }
 0x3d3   :  { %764 = vrot.lane.b32.xlu0 %v762_v0, %s3496_s29 }
 0x445   :  { %v765_v1 = vpop.permute.xlu0 %764 }
 0x446   :  { %767 = vst.msk [vmem:[#allocation2] sm:$0xff] %vm497_vm8, %v765_v1  ;;  %3024 = vmatmul.mubr.msk.f32.vlgmr.msra.gmra.mrb[16].mxu1 %vm497_vm8, %v765_v1 }
 0x447   :  { %3254 = vmatpush3.bf16.msra.mxu1 %v3745_v57  ;;  %3045 = vmatprep.mubr.msk.f32.mxu1 %vm3494_vm7, %v3492_v5 }
 0x448   :  { %3255 = vmatprep.subr.bf16.mxu1 %v3493_v54 }
 0x44b   :  { %3257 = vmatpush3.bf16.msra.mxu1 %v3755_v60 }
 0x44c   :  { %3264 = vmatprep.subr.bf16.mxu1 %v3493_v54 }
 0x519   :  { %v842_v2 = vpop.f32.mrb[16].mxu1 }
 0x51a   :  { %v846_v3 = vadd.f32 %v842_v2, %v621_v31  ;;  %v3025_v4 = vpop.f32.mrb[17].mxu1 }
 0x51c   :  { %3399 = vtanh.f32 %v846_v3  ;;  %v847_v7 = vmul.f32 0.5, %v846_v3 }
 0x51e   :  { %3401 = vtanh.f32 %v847_v7 }
 0x526   :  { %v3400_v6 = vpop.eup %3399 }
 0x527   :  { %854 = vrot.lane.b32.xlu1 %v3400_v6, %s3495_s28 }
 0x528   :  { %v3402_v8 = vpop.eup %3401 }
 0x529   :  { %v849_v9 = vmul.f32 0.5, %v3402_v8 }
 0x52b   :  { %v850_v10 = vadd.f32 0.5, %v849_v9 }
 0x52d   :  { %v852_v13 = vmul.f32 %v850_v10, %v756_v61 }
 0x599   :  { %v855_v11 = vpop.permute.xlu1 %854 }
 0x59a   :  { %v857_v12 = vmul.f32 %v855_v11, %v850_v10 }
 0x59c   :  { %859 = vrot.lane.b32.xlu0 %v857_v12, %s3496_s29 }
 0x60e   :  { %v860_v14 = vpop.permute.xlu0 %859 }
 0x60f   :  { %v862_v15 = vadd.f32 %v860_v14, %v852_v13 }
 0x611   :  { %3403 = vtanh.f32 %v862_v15 }
 0x61b   :  { %v3404_v16 = vpop.eup %3403 }
 0x61c   :  { %865 = vrot.lane.b32.xlu1 %v3404_v16, %s3495_s28 }
 0x68e   :  { %v866_v17 = vpop.permute.xlu1 %865 }
 0x68f   :  { %v868_v18 = vmul.f32 %v866_v17, %v850_v10 }
 0x691   :  { %870 = vrot.lane.b32.xlu0 %v868_v18, %s3496_s29 }
 0x703   :  { %v871_v19 = vpop.permute.xlu0 %870 }
 0x704   :  { %874 = vst.msk [vmem:[#allocation2 + $0x8] sm:$0xff] %vm497_vm8, %v871_v19  ;;  %3035 = vmatmul.mubr.msk.f32.vlgmr.msra.gmra.mrb[8].mxu0 %vm497_vm8, %v871_v19 }
 0x705   :  { %3260 = vmatpush3.bf16.msra.mxu0 %v3745_v57  ;;  %3056 = vmatprep.mubr.msk.f32.mxu0 %vm3494_vm7, %v3492_v5 }
 0x706   :  { %3261 = vmatprep.subr.bf16.mxu0 %v3493_v54 }
 0x709   :  { %3263 = vmatpush3.bf16.msra.mxu0 %v3755_v60 }
 0x70a   :  { %3270 = vmatprep.subr.bf16.mxu0 %v3493_v54 }
 0x7d7   :  { %v949_v20 = vpop.f32.mrb[8].mxu0 }
 0x7d8   :  { %v953_v21 = vadd.f32 %v949_v20, %v3798_v36  ;;  %v3036_v22 = vpop.f32.mrb[9].mxu0 }
 0x7da   :  { %3405 = vtanh.f32 %v953_v21  ;;  %v954_v24 = vmul.f32 0.5, %v953_v21 }
 0x7dc   :  { %3407 = vtanh.f32 %v954_v24 }
 0x7e4   :  { %v3406_v23 = vpop.eup %3405 }
 0x7e5   :  { %961 = vrot.lane.b32.xlu1 %v3406_v23, %s3495_s28 }
 0x7e6   :  { %v3408_v25 = vpop.eup %3407 }
 0x7e7   :  { %v956_v26 = vmul.f32 0.5, %v3408_v25  ;;  %v2758_v25 = vld [vmem:[%s4182_s7 + $0x28] sm:$0xff] }
 0x7e9   :  { %v957_v27 = vadd.f32 0.5, %v956_v26 }
 0x7eb   :  { %v959_v30 = vmul.f32 %v957_v27, %v862_v15 }
 0x857   :  { %v962_v28 = vpop.permute.xlu1 %961 }
 0x858   :  { %v964_v29 = vmul.f32 %v962_v28, %v957_v27 }
 0x85a   :  { %966 = vrot.lane.b32.xlu0 %v964_v29, %s3496_s29 }
 0x8cc   :  { %v967_v31 = vpop.permute.xlu0 %966 }
 0x8cd   :  { %v969_v32 = vadd.f32 %v967_v31, %v959_v30  ;;  %v2759_v30 = vld [vmem:[%s4182_s7 + $0x30] sm:$0xff]  ;;  %v2760_v31 = vld [vmem:[%s4182_s7 + $0x38] sm:$0xff] }
 0x8cf   :  { %3409 = vtanh.f32 %v969_v32 }
 0x8d9   :  { %v3410_v33 = vpop.eup %3409 }
 0x8da   :  { %972 = vrot.lane.b32.xlu1 %v3410_v33, %s3495_s28 }
 0x94c   :  { %v973_v35 = vpop.permute.xlu1 %972 }
 0x94d   :  { %v975_v36 = vmul.f32 %v973_v35, %v957_v27  ;;  %v1517_v35 = vld [vmem:[#allocation2] sm:$0xff] }
 0x94f   :  { %977 = vrot.lane.b32.xlu0 %v975_v36, %s3496_s29  ;;  %v1518_v36 = vld [vmem:[#allocation2 + $0x8] sm:$0xff] }
 0x9c1   :  { %v978_v37 = vpop.permute.xlu0 %977 }
 0x9c2   :  { %981 = vst.msk [vmem:[#allocation2 + $0x10] sm:$0xff] %vm497_vm8, %v978_v37  ;;  %3046 = vmatmul.mubr.msk.f32.vlgmr.msra.gmra.mrb[18].mxu1 %vm497_vm8, %v978_v37 }
 0x9c3   :  { %3266 = vmatpush3.bf16.msra.mxu1 %v3745_v57  ;;  %3067 = vmatprep.mubr.msk.f32.mxu1 %vm3494_vm7, %v3492_v5 }
 0x9c4   :  { %3267 = vmatprep.subr.bf16.mxu1 %v3493_v54 }
 0x9c7   :  { %3269 = vmatpush3.bf16.msra.mxu1 %v3755_v60 }
 0x9c8   :  { %3276 = vmatprep.subr.bf16.mxu1 %v3493_v54 }
 0x9c9   :  { %v1519_v37 = vld [vmem:[#allocation2 + $0x10] sm:$0xff] }
 0xa95   :  { %v1056_v39 = vpop.f32.mrb[18].mxu1 }
 0xa96   :  { %v1060_v41 = vadd.f32 %v1056_v39, %v3796_v34  ;;  %v3047_v43 = vpop.f32.mrb[19].mxu1 }
 0xa98   :  { %3411 = vtanh.f32 %v1060_v41  ;;  %v1061_v46 = vmul.f32 0.5, %v1060_v41 }
 0xa9a   :  { %3413 = vtanh.f32 %v1061_v46 }
 0xaa2   :  { %v3412_v45 = vpop.eup %3411 }
 0xaa3   :  { %1068 = vrot.lane.b32.xlu1 %v3412_v45, %s3495_s28 }
 0xaa4   :  { %v3414_v47 = vpop.eup %3413 }
 0xaa5   :  { %v1063_v48 = vmul.f32 0.5, %v3414_v47 }
 0xaa7   :  { %v1064_v49 = vadd.f32 0.5, %v1063_v48 }
 0xaa9   :  { %v1066_v52 = vmul.f32 %v1064_v49, %v969_v32  ;;  %v3286_v32 = vpack.c.bf16 %v2760_v31, %v2759_v30 }
 0xb15   :  { %v1069_v50 = vpop.permute.xlu1 %1068 }
 0xb16   :  { %v1071_v51 = vmul.f32 %v1069_v50, %v1064_v49 }
 0xb18   :  { %1073 = vrot.lane.b32.xlu0 %v1071_v51, %s3496_s29 }
 0xb8a   :  { %v1074_v53 = vpop.permute.xlu0 %1073 }
 0xb8b   :  { %v1076_v55 = vadd.f32 %v1074_v53, %v1066_v52 }
 0xb8d   :  { %3415 = vtanh.f32 %v1076_v55 }
 0xb97   :  { %v3416_v56 = vpop.eup %3415 }
 0xb98   :  { %1079 = vrot.lane.b32.xlu1 %v3416_v56, %s3495_s28 }
 0xc0a   :  { %v1080_v34 = vpop.permute.xlu1 %1079 }
 0xc0b   :  { %v1082_v58 = vmul.f32 %v1080_v34, %v1064_v49 }
 0xc0d   :  { %1084 = vrot.lane.b32.xlu0 %v1082_v58, %s3496_s29 }
 0xc7f   :  { %v1085_v59 = vpop.permute.xlu0 %1084 }
 0xc80   :  { %1088 = vst.msk [vmem:[#allocation2 + $0x18] sm:$0xff] %vm497_vm8, %v1085_v59  ;;  %3057 = vmatmul.mubr.msk.f32.vlgmr.msra.gmra.mrb[10].mxu0 %vm497_vm8, %v1085_v59 }
 0xc81   :  { %3272 = vmatpush3.bf16.msra.mxu0 %v3745_v57  ;;  %3078 = vmatprep.mubr.msk.f32.mxu0 %vm3494_vm7, %v3492_v5 }
 0xc82   :  { %3273 = vmatprep.subr.bf16.mxu0 %v3493_v54 }
 0xc85   :  { %3275 = vmatpush3.bf16.msra.mxu0 %v3755_v60 }
 0xc87   :  { %v1520_v39 = vld [vmem:[#allocation2 + $0x18] sm:$0xff] }
 0xd53   :  { %v1163_v61 = vpop.f32.mrb[10].mxu0 }
 0xd54   :  { %v1167_v62 = vadd.f32 %v1163_v61, %v3802_v40  ;;  %v3058_v63 = vpop.f32.mrb[11].mxu0 }
 0xd56   :  { %3417 = vtanh.f32 %v1167_v62  ;;  %v1168_v1 = vmul.f32 0.5, %v1167_v62 }
 0xd58   :  { %3419 = vtanh.f32 %v1168_v1 }
 0xd60   :  { %v3418_v0 = vpop.eup %3417 }
 0xd61   :  { %1175 = vrot.lane.b32.xlu1 %v3418_v0, %s3495_s28 }
 0xd62   :  { %v3420_v2 = vpop.eup %3419 }
 0xd63   :  { %v1170_v3 = vmul.f32 0.5, %v3420_v2  ;;  %v2771_v2 = vld [vmem:[%s4183_s8 + $0x20] sm:$0xff] }
 0xd65   :  { %v1171_v4 = vadd.f32 0.5, %v1170_v3  ;;  %v2772_v3 = vld [vmem:[%s4183_s8 + $0x28] sm:$0xff] }
 0xd67   :  { %v1173_v8 = vmul.f32 %v1171_v4, %v1076_v55 }
 0xdd3   :  { %v1176_v6 = vpop.permute.xlu1 %1175 }
 0xdd4   :  { %v1178_v7 = vmul.f32 %v1176_v6, %v1171_v4  ;;  %v2773_v6 = vld [vmem:[%s4183_s8 + $0x30] sm:$0xff] }
 0xdd6   :  { %1180 = vrot.lane.b32.xlu0 %v1178_v7, %s3496_s29  ;;  %v2774_v7 = vld [vmem:[%s4183_s8 + $0x38] sm:$0xff] }
 0xe48   :  { %v1181_v9 = vpop.permute.xlu0 %1180 }
 0xe49   :  { %v1183_v10 = vadd.f32 %v1181_v9, %v1173_v8  ;;  %v3929_v8 = vpack.c.bf16 %v2774_v7, %v2773_v6 }
 0xe4b   :  { %3421 = vtanh.f32 %v1183_v10 }
 0xe55   :  { %v3422_v11 = vpop.eup %3421 }
 0xe56   :  { %1186 = vrot.lane.b32.xlu1 %v3422_v11, %s3495_s28 }
 0xec8   :  { %v1187_v40 = vpop.permute.xlu1 %1186 }
 0xec9   :  { %v1189_v12 = vmul.f32 %v1187_v40, %v1171_v4  ;;  %v3919_v4 = vpack.c.bf16 %v2772_v3, %v2771_v2 }
 0xecb   :  { %1191 = vrot.lane.b32.xlu0 %v1189_v12, %s3496_s29 }
 0xf3d   :  { %v1192_v13 = vpop.permute.xlu0 %1191 }
 0xf3e   :  { %1195 = vst.msk [vmem:[#allocation2 + $0x20] sm:$0xff] %vm497_vm8, %v1192_v13  ;;  %3068 = vmatmul.mubr.msk.f32.vlgmr.msra.gmra.mrb[20].mxu1 %vm497_vm8, %v1192_v13 }
 0xf3f   :  { %3278 = vmatpush3.bf16.msra.mxu1 %v3745_v57  ;;  %3089 = vmatprep.mubr.msk.f32.mxu1 %vm3494_vm7, %v3492_v5 }
 0xf40   :  { %3279 = vmatprep.subr.bf16.mxu1 %v3493_v54 }
 0xf43   :  { %3281 = vmatpush3.bf16.msra.mxu1 %v3755_v60 }
 0xf44   :  { %3290 = vmatprep.subr.bf16.mxu1 %v3493_v54 }
 0xf45   :  { %v1521_v41 = vld [vmem:[#allocation2 + $0x20] sm:$0xff] }
0x1011   :  { %v1270_v14 = vpop.f32.mrb[20].mxu1 }
0x1012   :  { %v1274_v15 = vadd.f32 %v1270_v14, %v3800_v38  ;;  %v3069_v16 = vpop.f32.mrb[21].mxu1  ;;  %v2757_v38 = vld [vmem:[%s4182_s7 + $0x20] sm:$0xff] }
0x1013   :  { %v3282_v26 = vpack.c.bf16 %v2758_v25, %v2757_v38 }
0x1014   :  { %3423 = vtanh.f32 %v1274_v15  ;;  %v1275_v18 = vmul.f32 0.5, %v1274_v15  ;;  %v3954_v15 = vld [vmem:[%s4185_s9 + $0x1] ss:$0 sm:$0xff] }
0x1015   :  { %3283 = vmatprep.subr.bf16.mxu0 %v3282_v26 }
0x1016   :  { %3425 = vtanh.f32 %v1275_v18 }
0x101e   :  { %v3424_v17 = vpop.eup %3423 }
0x101f   :  { %1282 = vrot.lane.b32.xlu1 %v3424_v17, %s3495_s28 }
0x1020   :  { %v3426_v57 = vpop.eup %3425 }
0x1021   :  { %v1277_v19 = vmul.f32 0.5, %v3426_v57 }
0x1023   :  { %v1278_v20 = vadd.f32 0.5, %v1277_v19 }
0x1025   :  { %v1280_v60 = vmul.f32 %v1278_v20, %v1183_v10 }
0x1091   :  { %v1283_v21 = vpop.permute.xlu1 %1282 }
0x1092   :  { %v1285_v22 = vmul.f32 %v1283_v21, %v1278_v20 }
0x1094   :  { %1287 = vrot.lane.b32.xlu0 %v1285_v22, %s3496_s29 }
0x1106   :  { %v1288_v23 = vpop.permute.xlu0 %1287 }
0x1107   :  { %v1290_v24 = vadd.f32 %v1288_v23, %v1280_v60 }
0x1109   :  { %3427 = vtanh.f32 %v1290_v24 }
0x1113   :  { %v3428_v27 = vpop.eup %3427 }
0x1114   :  { %1293 = vrot.lane.b32.xlu1 %v3428_v27, %s3495_s28 }
0x1186   :  { %v1294_v28 = vpop.permute.xlu1 %1293 }
0x1187   :  { %v1296_v29 = vmul.f32 %v1294_v28, %v1278_v20 }
0x1189   :  { %1298 = vrot.lane.b32.xlu0 %v1296_v29, %s3496_s29 }
0x11fb   :  { %v1299_v33 = vpop.permute.xlu0 %1298 }
0x11fc   :  { %1302 = vst.msk [vmem:[#allocation2 + $0x28] sm:$0xff] %vm497_vm8, %v1299_v33  ;;  %3079 = vmatmul.mubr.msk.f32.vlgmr.msra.gmra.mrb[12].mxu0 %vm497_vm8, %v1299_v33 }
0x11fd   :  { %3285 = vmatpush3.bf16.msra.mxu0 %v3282_v26  ;;  %3100 = vmatprep.mubr.msk.f32.mxu0 %vm497_vm8, %v1517_v35 }
0x11fe   :  { %3287 = vmatprep.subr.bf16.mxu0 %v3286_v32 }
0x1201   :  { %3289 = vmatpush3.bf16.msra.mxu0 %v3286_v32 }
0x1202   :  { %3302 = vmatprep.subr.bf16.mxu0 %v3493_v54 }
0x1203   :  { %v1522_v43 = vld [vmem:[#allocation2 + $0x28] sm:$0xff] }
0x1204   :  { %3101 = vmatmul.mubr.msk.f32.vlgmr.msra.gmra.mrb[14].mxu0 %vm497_vm8, %v1518_v36 }
0x1205   :  { %3103 = vmatprep.mubr.msk.f32.mxu0 %vm497_vm8, %v1519_v37  ;;  %3304 = vmatpush3.bf16.msra.mxu0 %v3919_v4 }
0x1206   :  { %3305 = vmatprep.subr.bf16.mxu0 %v3493_v54 }
0x1208   :  { %3104 = vmatmul.mubr.msk.f32.gmra.mrb[16].mxu0 %vm497_vm8, %v1520_v39 }
0x1209   :  { %3106 = vmatprep.mubr.msk.f32.mxu0 %vm497_vm8, %v1521_v41  ;;  %3307 = vmatpush3.bf16.msra.mxu0 %v3929_v8 }
0x120a   :  { %3314 = vmatprep.subr.bf16.mxu0 %v3493_v54 }
0x120c   :  { %3107 = vmatmul.mubr.msk.f32.gmra.mrb[18].mxu0 %vm497_vm8, %v1522_v43 }
0x12cf   :  { %v1377_v45 = vpop.f32.mrb[12].mxu0 }
0x12d0   :  { %v1381_v46 = vadd.f32 %v1377_v45, %v3806_v44  ;;  %v3080_v47 = vpop.f32.mrb[13].mxu0 }
0x12d2   :  { %3429 = vtanh.f32 %v1381_v46  ;;  %v1382_v56 = vmul.f32 0.5, %v1381_v46 }
0x12d4   :  { %3431 = vtanh.f32 %v1382_v56 }
0x12d7   :  { %v3897_v48 = vpop.f32.mrb[14].mxu0 }
0x12d8   :  { %v1628_v49 = vpop.f32.mrb[15].mxu0 }
0x12d9   :  { %v1629_v16 = vadd.f32 %v3954_v15, %v1628_v49  ;;  %v1634_v49 = vadd.f32 %v3897_v48, %v3954_v15 }
0x12db   :  { %v3899_v50 = vpop.f32.mrb[16].mxu0 }
0x12dc   :  { %v3430_v51 = vpop.eup %3429  ;;  %v3901_v52 = vpop.f32.mrb[17].mxu0 }
0x12dd   :  { %1389 = vrot.lane.b32.xlu1 %v3430_v51, %s3495_s28 }
0x12de   :  { %v3432_v34 = vpop.eup %3431 }
0x12df   :  { %v3904_v53 = vpop.f32.mrb[18].mxu0  ;;  %v1384_v44 = vmul.f32 0.5, %v3432_v34 }
0x12e0   :  { %v3906_v55 = vpop.f32.mrb[19].mxu0 }
0x12e1   :  { %v1385_v58 = vadd.f32 0.5, %v1384_v44 }
0x12e3   :  { %v1387_v62 = vmul.f32 %v1385_v58, %v1290_v24 }
0x134f   :  { %v1390_v59 = vpop.permute.xlu1 %1389 }
0x1350   :  { %v1392_v61 = vmul.f32 %v1390_v59, %v1385_v58 }
0x1352   :  { %1394 = vrot.lane.b32.xlu0 %v1392_v61, %s3496_s29 }
0x13c4   :  { %v1395_v63 = vpop.permute.xlu0 %1394 }
0x13c5   :  { %v3909_v0 = vadd.f32 %v1395_v63, %v1387_v62 }
0x13c7   :  { %3433 = vtanh.f32 %v3909_v0 }
0x13d1   :  { %v3434_v1 = vpop.eup %3433 }
0x13d2   :  { %1400 = vrot.lane.b32.xlu1 %v3434_v1, %s3495_s28 }
0x1444   :  { %v1401_v9 = vpop.permute.xlu1 %1400 }
0x1445   :  { %v1403_v10 = vmul.f32 %v1401_v9, %v1385_v58 }
0x1447   :  { %1405 = vrot.lane.b32.xlu0 %v1403_v10, %s3496_s29 }
0x14b9   :  { %v1406_v11 = vpop.permute.xlu0 %1405 }
0x14ba   :  { %1409 = vst.msk [vmem:[#allocation2 + $0x30] sm:$0xff] %vm497_vm8, %v1406_v11  ;;  %3090 = vmatmul.mubr.msk.f32.vlgmr.msra.gmra.mrb[22].mxu1 %vm497_vm8, %v1406_v11 }
0x14bb   :  { %3292 = vmatpush3.bf16.msra.mxu1 %v3919_v4  ;;  %3120 = vmatprep.mubr.msk.f32.mxu1 %vm3494_vm7, %v3492_v5 }
0x14bc   :  { %3293 = vmatprep.subr.bf16.mxu1 %v3493_v54 }
0x14bf   :  { %3295 = vmatpush3.bf16.msra.mxu1 %v3929_v8 }
0x14c0   :  { %3296 = vmatprep.subr.bf16.mxu1 %v3493_v54 }
0x14c1   :  { %v1523_v40 = vld [vmem:[#allocation2 + $0x30] sm:$0xff] }
0x14c2   :  { %3121 = vmatmul.mubr.f32.vlgmr.msra.gmra.mrb[24].mxu1 %v3492_v5  ;;  %3109 = vmatprep.mubr.msk.f32.mxu0 %vm497_vm8, %v1523_v40 }
0x14c3   :  { %3298 = vmatpush3.bf16.msra.mxu1 %v3919_v4  ;;  %3131 = vmatprep.mubr.msk.f32.mxu1 %vm3494_vm7, %v3492_v5 }
0x14c4   :  { %3299 = vmatprep.subr.bf16.mxu1 %v3493_v54 }
0x14c7   :  { %3301 = vmatpush3.bf16.msra.mxu1 %v3929_v8 }
0x14c8   :  { %3308 = vmatprep.subr.bf16.mxu1 %v3493_v54 }
0x158d   :  { %v1484_v12 = vpop.f32.mrb[22].mxu1 }
0x158e   :  { %v1488_v13 = vadd.f32 %v1484_v12, %v3804_v42  ;;  %v3091_v14 = vpop.f32.mrb[23].mxu1 }
0x1590   :  { %v1489_v28 = vmul.f32 0.5, %v1488_v13 }
0x1595   :  { %v1747_v17 = vpop.f32.mrb[24].mxu1 }
0x1596   :  { %v1751_v18 = vadd.f32 %v1747_v17, %v1629_v16  ;;  %v3122_v57 = vpop.f32.mrb[25].mxu1 }
0x1598   :  { %3435 = vtanh.f32 %v1751_v18  ;;  %v1752_v20 = vmul.f32 0.5, %v1751_v18 }
0x159a   :  { %3437 = vtanh.f32 %v1752_v20 }
0x15a2   :  { %v3436_v19 = vpop.eup %3435 }
0x15a3   :  { %1759 = vrot.lane.b32.xlu1 %v3436_v19, %s3495_s28 }
0x15a4   :  { %v3438_v21 = vpop.eup %3437 }
0x15a5   :  { %v1754_v22 = vmul.f32 0.5, %v3438_v21 }
0x15a7   :  { %v1755_v42 = vadd.f32 0.5, %v1754_v22 }
0x15a9   :  { %v1757_v24 = vmul.f32 0.0, %v1755_v42 }
0x1615   :  { %v1760_v60 = vpop.permute.xlu1 %1759 }
0x1616   :  { %v1762_v23 = vmul.f32 %v1760_v60, %v1755_v42 }
0x1618   :  { %1764 = vrot.lane.b32.xlu0 %v1762_v23, %s3496_s29 }
0x168a   :  { %v1765_v38 = vpop.permute.xlu0 %1764 }
0x168b   :  { %v1767_v25 = vadd.f32 %v1765_v38, %v1757_v24 }
0x168d   :  { %3439 = vtanh.f32 %v1767_v25 }
0x168e   :  { %3441 = vtanh.f32 %v1488_v13  ;;  %v1639_v13 = vadd.f32 %v3954_v15, %v3901_v52 }
0x168f   :  { %3443 = vtanh.f32 %v1489_v28 }
0x1697   :  { %v3440_v26 = vpop.eup %3439 }
0x1698   :  { %1770 = vrot.lane.b32.xlu1 %v3440_v26, %s3495_s28  ;;  %v3442_v27 = vpop.eup %3441 }
0x1699   :  { %v3444_v29 = vpop.eup %3443 }
0x169a   :  { %v1491_v30 = vmul.f32 0.5, %v3444_v29 }
0x169c   :  { %1496 = vrot.lane.b32.xlu1 %v3442_v27, %s3495_s28  ;;  %v1492_v33 = vadd.f32 0.5, %v1491_v30  ;;  %v1644_v27 = vadd.f32 %v3899_v50, %v3954_v15 }
0x169e   :  { %v1494_v39 = vmul.f32 %v1492_v33, %v3909_v0 }
0x170a   :  { %v1771_v31 = vpop.permute.xlu1 %1770 }
0x170b   :  { %v1773_v32 = vmul.f32 %v1771_v31, %v1755_v42 }
0x170d   :  { %1775 = vrot.lane.b32.xlu0 %v1773_v32, %s3496_s29 }
0x170e   :  { %v1497_v35 = vpop.permute.xlu1 %1496 }
0x170f   :  { %v1499_v36 = vmul.f32 %v1497_v35, %v1492_v33 }
0x1711   :  { %1501 = vrot.lane.b32.xlu1 %v1499_v36, %s3496_s29 }
0x177f   :  { %v1776_v37 = vpop.permute.xlu0 %1775 }
0x1780   :  { %1778 = vst.msk [vmem:[#allocation2] sm:$0xff] %vm497_vm8, %v1776_v37  ;;  %3132 = vmatmul.mubr.msk.f32.vlgmr.msra.gmra.mrb[26].mxu1 %vm497_vm8, %v1776_v37 }
0x1781   :  { %3310 = vmatpush3.bf16.msra.mxu1 %v3919_v4  ;;  %3153 = vmatprep.mubr.msk.f32.mxu1 %vm3494_vm7, %v3492_v5 }
0x1782   :  { %3311 = vmatprep.subr.bf16.mxu1 %v3493_v54 }
0x1783   :  { %v1502_v41 = vpop.permute.xlu1 %1501 }
0x1784   :  { %v1504_v43 = vadd.f32 %v1502_v41, %v1494_v39 }
0x1785   :  { %3313 = vmatpush3.bf16.msra.mxu1 %v3929_v8 }
0x1786   :  { %3445 = vtanh.f32 %v1504_v43  ;;  %3320 = vmatprep.subr.bf16.mxu1 %v3493_v54 }
0x1790   :  { %v3446_v45 = vpop.eup %3445 }
0x1791   :  { %1507 = vrot.lane.b32.xlu1 %v3446_v45, %s3495_s28 }
0x1803   :  { %v1508_v46 = vpop.permute.xlu1 %1507 }
0x1804   :  { %v1510_v47 = vmul.f32 %v1508_v46, %v1492_v33 }
0x1806   :  { %1512 = vrot.lane.b32.xlu1 %v1510_v47, %s3496_s29 }
0x1853   :  { %v1852_v51 = vpop.f32.mrb[26].mxu1 }
0x1854   :  { %v1856_v56 = vadd.f32 %v1852_v51, %v1634_v49  ;;  %v3133_v34 = vpop.f32.mrb[27].mxu1  ;;  %v1649_v51 = vadd.f32 %v3954_v15, %v3906_v55 }
0x1856   :  { %3447 = vtanh.f32 %v1856_v56  ;;  %v1857_v61 = vmul.f32 0.5, %v1856_v56 }
0x1858   :  { %3449 = vtanh.f32 %v1857_v61 }
0x1860   :  { %v3448_v44 = vpop.eup %3447 }
0x1861   :  { %1864 = vrot.lane.b32.xlu0 %v3448_v44, %s3495_s28 }
0x1862   :  { %v3450_v62 = vpop.eup %3449 }
0x1863   :  { %v1859_v48 = vmul.f32 0.5, %v3450_v62 }
0x1865   :  { %v1860_v63 = vadd.f32 0.5, %v1859_v48 }
0x1867   :  { %v1862_v2 = vmul.f32 %v1860_v63, %v1767_v25 }
0x1878   :  { %v1513_v58 = vpop.permute.xlu1 %1512 }
0x1879   :  { %1516 = vst.msk [vmem:[#allocation2 + $0x38] sm:$0xff] %vm497_vm8, %v1513_v58 }
0x1880   :  { %v1524_v59 = vld [vmem:[#allocation2 + $0x38] sm:$0xff] }
0x1881   :  { %3110 = vmatmul.mubr.msk.f32.gmra.mrb[20].mxu0 %vm497_vm8, %v1524_v59 }
0x1882   :  { %3142 = vmatprep.mubr.msk.f32.mxu0 %vm3494_vm7, %v3492_v5 }
0x18d3   :  { %v1865_v0 = vpop.permute.xlu0 %1864 }
0x18d4   :  { %v1867_v1 = vmul.f32 %v1865_v0, %v1860_v63 }
0x18d6   :  { %1869 = vrot.lane.b32.xlu0 %v1867_v1, %s3496_s29 }
0x1948   :  { %v1870_v3 = vpop.permute.xlu0 %1869 }
0x1949   :  { %v1872_v6 = vadd.f32 %v1870_v3, %v1862_v2 }
0x194b   :  { %3451 = vtanh.f32 %v1872_v6 }
0x1954   :  { %v3982_v7 = vpop.f32.mrb[20].mxu0 }
0x1955   :  { %v3452_v9 = vpop.eup %3451  ;;  %v3984_v10 = vpop.f32.mrb[21].mxu0 }
0x1956   :  { %1875 = vrot.lane.b32.xlu0 %v3452_v9, %s3495_s28 }
0x19c8   :  { %v1876_v11 = vpop.permute.xlu0 %1875 }
0x19c9   :  { %v1878_v40 = vmul.f32 %v1876_v11, %v1860_v63 }
0x19cb   :  { %1880 = vrot.lane.b32.xlu0 %v1878_v40, %s3496_s29  ;;  %v1654_v40 = vadd.f32 %v3904_v53, %v3954_v15  ;;  %v2522_v53 = vld [vmem:[%s4186_s10] sm:$0xff] }
0x1a3d   :  { %v1881_v12 = vpop.permute.xlu0 %1880 }
0x1a3e   :  { %1883 = vst.msk [vmem:[#allocation2 + $0x8] sm:$0xff] %vm497_vm8, %v1881_v12  ;;  %3143 = vmatmul.mubr.msk.f32.vlgmr.msra.gmra.mrb[22].mxu0 %vm497_vm8, %v1881_v12 }
0x1a3f   :  { %3316 = vmatpush3.bf16.msra.mxu0 %v3919_v4  ;;  %3164 = vmatprep.mubr.msk.f32.mxu0 %vm3494_vm7, %v3492_v5 }
0x1a40   :  { %3317 = vmatprep.subr.bf16.mxu0 %v3493_v54 }
0x1a43   :  { %3319 = vmatpush3.bf16.msra.mxu0 %v3929_v8 }
0x1a44   :  { %3326 = vmatprep.subr.bf16.mxu0 %v3493_v54 }
0x1b11   :  { %v1957_v14 = vpop.f32.mrb[22].mxu0 }
0x1b12   :  { %v1961_v16 = vadd.f32 %v1957_v14, %v1639_v13  ;;  %v3144_v17 = vpop.f32.mrb[23].mxu0 }
0x1b14   :  { %3453 = vtanh.f32 %v1961_v16  ;;  %v1962_v57 = vmul.f32 0.5, %v1961_v16 }
0x1b16   :  { %3455 = vtanh.f32 %v1962_v57 }
0x1b1e   :  { %v3454_v18 = vpop.eup %3453 }
0x1b1f   :  { %1969 = vrot.lane.b32.xlu1 %v3454_v18, %s3495_s28 }
0x1b20   :  { %v3456_v19 = vpop.eup %3455 }
0x1b21   :  { %v1964_v20 = vmul.f32 0.5, %v3456_v19 }
0x1b23   :  { %v1965_v21 = vadd.f32 0.5, %v1964_v20 }
0x1b25   :  { %v1967_v60 = vmul.f32 %v1965_v21, %v1872_v6 }
0x1b91   :  { %v1970_v22 = vpop.permute.xlu1 %1969 }
0x1b92   :  { %v1972_v42 = vmul.f32 %v1970_v22, %v1965_v21 }
0x1b94   :  { %1974 = vrot.lane.b32.xlu0 %v1972_v42, %s3496_s29 }
0x1c06   :  { %v1975_v23 = vpop.permute.xlu0 %1974 }
0x1c07   :  { %v1977_v24 = vadd.f32 %v1975_v23, %v1967_v60 }
0x1c09   :  { %3457 = vtanh.f32 %v1977_v24 }
0x1c13   :  { %v3458_v52 = vpop.eup %3457 }
0x1c14   :  { %1980 = vrot.lane.b32.xlu1 %v3458_v52, %s3495_s28  ;;  %v2525_v52 = vld [vmem:[%s4186_s10 + $0x18] sm:$0xff] }
0x1c86   :  { %v1981_v38 = vpop.permute.xlu1 %1980 }
0x1c87   :  { %v1983_v25 = vmul.f32 %v1981_v38, %v1965_v21  ;;  %v2523_v21 = vld [vmem:[%s4186_s10 + $0x8] sm:$0xff] }
0x1c88   :  { %v3338_v22 = vpack.c.bf16 %v2523_v21, %v2522_v53 }
0x1c89   :  { %1985 = vrot.lane.b32.xlu0 %v1983_v25, %s3496_s29 }
0x1cfb   :  { %v1986_v26 = vpop.permute.xlu0 %1985 }
0x1cfc   :  { %1988 = vst.msk [vmem:[#allocation2 + $0x10] sm:$0xff] %vm497_vm8, %v1986_v26  ;;  %3154 = vmatmul.mubr.msk.f32.vlgmr.msra.gmra.mrb[28].mxu1 %vm497_vm8, %v1986_v26  ;;  %v2514_v26 = vld [vmem:[#allocation2] sm:$0xff] }
0x1cfd   :  { %3322 = vmatpush3.bf16.msra.mxu1 %v3919_v4  ;;  %3175 = vmatprep.mubr.msk.f32.mxu1 %vm3494_vm7, %v3492_v5 }
0x1cfe   :  { %3323 = vmatprep.subr.bf16.mxu1 %v3493_v54 }
0x1d01   :  { %3325 = vmatpush3.bf16.msra.mxu1 %v3929_v8 }
0x1d02   :  { %3332 = vmatprep.subr.bf16.mxu1 %v3493_v54 }
0x1dcf   :  { %v2062_v28 = vpop.f32.mrb[28].mxu1 }
0x1dd0   :  { %v2066_v29 = vadd.f32 %v2062_v28, %v1644_v27  ;;  %v3155_v30 = vpop.f32.mrb[29].mxu1  ;;  %v2515_v27 = vld [vmem:[#allocation2 + $0x8] sm:$0xff]  ;;  %v2516_v28 = vld [vmem:[#allocation2 + $0x10] sm:$0xff] }
0x1dd2   :  { %3459 = vtanh.f32 %v2066_v29  ;;  %v2067_v32 = vmul.f32 0.5, %v2066_v29 }
0x1dd4   :  { %3461 = vtanh.f32 %v2067_v32  ;;  %v1659_v32 = vadd.f32 %v3954_v15, %v3984_v10  ;;  %v2662_v10 = vld [vmem:[%s4178_s2] sm:$0xff] }
0x1ddc   :  { %v3460_v31 = vpop.eup %3459 }
0x1ddd   :  { %2074 = vrot.lane.b32.xlu1 %v3460_v31, %s3495_s28 }
0x1dde   :  { %v3462_v33 = vpop.eup %3461 }
0x1ddf   :  { %v2069_v35 = vmul.f32 0.5, %v3462_v33 }
0x1de1   :  { %v2070_v36 = vadd.f32 0.5, %v2069_v35 }
0x1de3   :  { %v2072_v41 = vmul.f32 %v2070_v36, %v1977_v24  ;;  %v2524_v24 = vld [vmem:[%s4186_s10 + $0x10] sm:$0xff] }
0x1de4   :  { %v3342_v38 = vpack.c.bf16 %v2525_v52, %v2524_v24 }
0x1e4f   :  { %v2075_v37 = vpop.permute.xlu1 %2074 }
0x1e50   :  { %v2077_v39 = vmul.f32 %v2075_v37, %v2070_v36  ;;  %v4070_v37 = vld [vmem:[%s4187_s11] ss:$0 sm:$0xff] }
0x1e52   :  { %2079 = vrot.lane.b32.xlu0 %v2077_v39, %s3496_s29 }
0x1ec4   :  { %v2080_v43 = vpop.permute.xlu0 %2079 }
0x1ec5   :  { %v2082_v45 = vadd.f32 %v2080_v43, %v2072_v41  ;;  %v2663_v41 = vld [vmem:[%s4178_s2 + $0x8] sm:$0xff] }
0x1ec7   :  { %3463 = vtanh.f32 %v2082_v45 }
0x1ed1   :  { %v3464_v50 = vpop.eup %3463 }
0x1ed2   :  { %2085 = vrot.lane.b32.xlu1 %v3464_v50, %s3495_s28  ;;  %v2679_v50 = vld [vmem:[%s4181_s1 + $0x8] sm:$0xff] }
0x1f44   :  { %v2086_v46 = vpop.permute.xlu1 %2085 }
0x1f45   :  { %v2088_v47 = vmul.f32 %v2086_v46, %v2070_v36 }
0x1f47   :  { %2090 = vrot.lane.b32.xlu0 %v2088_v47, %s3496_s29 }
0x1fb9   :  { %v2091_v49 = vpop.permute.xlu0 %2090 }
0x1fba   :  { %2093 = vst.msk [vmem:[#allocation2 + $0x18] sm:$0xff] %vm497_vm8, %v2091_v49  ;;  %3165 = vmatmul.mubr.msk.f32.vlgmr.msra.gmra.mrb[24].mxu0 %vm497_vm8, %v2091_v49  ;;  %v2678_v49 = vld [vmem:[%s4181_s1] sm:$0xff] }
0x1fbb   :  { %3328 = vmatpush3.bf16.msra.mxu0 %v3919_v4  ;;  %3186 = vmatprep.mubr.msk.f32.mxu0 %vm3494_vm7, %v3492_v5 }
0x1fbc   :  { %3329 = vmatprep.subr.bf16.mxu0 %v3493_v54 }
0x1fbf   :  { %3331 = vmatpush3.bf16.msra.mxu0 %v3929_v8 }
0x1fc0   :  { %3339 = vmatprep.subr.bf16.mxu0 %v3338_v22 }
0x1fc1   :  { %v2517_v29 = vld [vmem:[#allocation2 + $0x18] sm:$0xff] }
0x208d   :  { %v2167_v56 = vpop.f32.mrb[24].mxu0 }
0x208e   :  { %v2171_v34 = vadd.f32 %v2167_v56, %v1649_v51  ;;  %v3166_v44 = vpop.f32.mrb[25].mxu0 }
0x2090   :  { %3465 = vtanh.f32 %v2171_v34  ;;  %v2172_v59 = vmul.f32 0.5, %v2171_v34  ;;  %v2665_v34 = vld [vmem:[%s4178_s2 + $0x18] sm:$0xff] }
0x2092   :  { %3467 = vtanh.f32 %v2172_v59 }
0x209a   :  { %v3466_v58 = vpop.eup %3465 }
0x209b   :  { %2179 = vrot.lane.b32.xlu1 %v3466_v58, %s3495_s28 }
0x209c   :  { %v3468_v61 = vpop.eup %3467 }
0x209d   :  { %v2174_v62 = vmul.f32 0.5, %v3468_v61 }
0x209f   :  { %v2175_v48 = vadd.f32 0.5, %v2174_v62  ;;  %v2664_v62 = vld [vmem:[%s4178_s2 + $0x10] sm:$0xff] }
0x20a1   :  { %v2177_v1 = vmul.f32 %v2175_v48, %v2082_v45 }
0x210d   :  { %v2180_v63 = vpop.permute.xlu1 %2179 }
0x210e   :  { %v2182_v0 = vmul.f32 %v2180_v63, %v2175_v48  ;;  %v2681_v63 = vld [vmem:[%s4181_s1 + $0x18] sm:$0xff] }
0x2110   :  { %2184 = vrot.lane.b32.xlu0 %v2182_v0, %s3496_s29 }
0x2182   :  { %v2185_v2 = vpop.permute.xlu0 %2184 }
0x2183   :  { %v2187_v3 = vadd.f32 %v2185_v2, %v2177_v1  ;;  %v2680_v2 = vld [vmem:[%s4181_s1 + $0x10] sm:$0xff] }
0x2185   :  { %3469 = vtanh.f32 %v2187_v3 }
0x218f   :  { %v3470_v55 = vpop.eup %3469 }
0x2190   :  { %2190 = vrot.lane.b32.xlu1 %v3470_v55, %s3495_s28 }
0x2202   :  { %v2191_v6 = vpop.permute.xlu1 %2190 }
0x2203   :  { %v2193_v9 = vmul.f32 %v2191_v6, %v2175_v48  ;;  %v2667_v6 = vld [vmem:[%s4178_s2 + $0x28] sm:$0xff] }
0x2205   :  { %2195 = vrot.lane.b32.xlu0 %v2193_v9, %s3496_s29 }
0x2277   :  { %v2196_v11 = vpop.permute.xlu0 %2195 }
0x2278   :  { %2198 = vst.msk [vmem:[#allocation2 + $0x20] sm:$0xff] %vm497_vm8, %v2196_v11  ;;  %3176 = vmatmul.mubr.msk.f32.vlgmr.msra.gmra.mrb[30].mxu1 %vm497_vm8, %v2196_v11 }
0x2279   :  { %3334 = vmatpush3.bf16.msra.mxu1 %v3919_v4  ;;  %3197 = vmatprep.mubr.msk.f32.mxu1 %vm3494_vm7, %v3492_v5 }
0x227a   :  { %3335 = vmatprep.subr.bf16.mxu1 %v3493_v54 }
0x227d   :  { %3337 = vmatpush3.bf16.msra.mxu1 %v3929_v8 }
0x227f   :  { %v2518_v30 = vld [vmem:[#allocation2 + $0x20] sm:$0xff] }
0x234b   :  { %v2272_v12 = vpop.f32.mrb[30].mxu1 }
0x234c   :  { %v2276_v13 = vadd.f32 %v2272_v12, %v1654_v40  ;;  %v3177_v14 = vpop.f32.mrb[31].mxu1  ;;  %v2666_v12 = vld [vmem:[%s4178_s2 + $0x20] sm:$0xff] }
0x234d   :  { %v2683_v14 = vld [vmem:[%s4181_s1 + $0x28] sm:$0xff] }
0x234e   :  { %3471 = vtanh.f32 %v2276_v13  ;;  %v2277_v17 = vmul.f32 0.5, %v2276_v13 }
0x2350   :  { %3473 = vtanh.f32 %v2277_v17 }
0x2358   :  { %v3472_v16 = vpop.eup %3471 }
0x2359   :  { %2284 = vrot.lane.b32.xlu1 %v3472_v16, %s3495_s28 }
0x235a   :  { %v3474_v4 = vpop.eup %3473 }
0x235b   :  { %v2279_v18 = vmul.f32 0.5, %v3474_v4  ;;  %v2682_v4 = vld [vmem:[%s4181_s1 + $0x20] sm:$0xff] }
0x235d   :  { %v2280_v57 = vadd.f32 0.5, %v2279_v18 }
0x235f   :  { %v2282_v54 = vmul.f32 %v2280_v57, %v2187_v3 }
0x23cb   :  { %v2285_v5 = vpop.permute.xlu1 %2284 }
0x23cc   :  { %v2287_v19 = vmul.f32 %v2285_v5, %v2280_v57 }
0x23ce   :  { %2289 = vrot.lane.b32.xlu0 %v2287_v19, %s3496_s29 }
0x2440   :  { %v2290_v8 = vpop.permute.xlu0 %2289 }
0x2441   :  { %v4040_v20 = vadd.f32 %v2290_v8, %v2282_v54 }
0x2443   :  { %3475 = vtanh.f32 %v4040_v20 }
0x244d   :  { %v3476_v42 = vpop.eup %3475 }
0x244e   :  { %2295 = vrot.lane.b32.xlu1 %v3476_v42, %s3495_s28 }
0x24c0   :  { %v2296_v60 = vpop.permute.xlu1 %2295 }
0x24c1   :  { %v2298_v23 = vmul.f32 %v2296_v60, %v2280_v57 }
0x24c3   :  { %2300 = vrot.lane.b32.xlu0 %v2298_v23, %s3496_s29 }
0x2535   :  { %v2301_v25 = vpop.permute.xlu0 %2300 }
0x2536   :  { %2303 = vst.msk [vmem:[#allocation2 + $0x28] sm:$0xff] %vm497_vm8, %v2301_v25  ;;  %3187 = vmatmul.mubr.msk.f32.vlgmr.msra.gmra.mrb[26].mxu0 %vm497_vm8, %v2301_v25 }
0x2537   :  { %3341 = vmatpush3.bf16.msra.mxu0 %v3338_v22  ;;  %3208 = vmatprep.mubr.msk.f32.mxu0 %vm497_vm8, %v2514_v26 }
0x2538   :  { %3343 = vmatprep.subr.bf16.mxu0 %v3342_v38 }
0x253b   :  { %3345 = vmatpush3.bf16.msra.mxu0 %v3342_v38 }
0x253d   :  { %v2519_v31 = vld [vmem:[#allocation2 + $0x28] sm:$0xff] }
0x253e   :  { %3209 = vmatmul.mubr.msk.f32.vlgmr.msra.gmra.mrb[28].mxu0 %vm497_vm8, %v2515_v27 }
0x253f   :  { %3211 = vmatprep.mubr.msk.f32.mxu0 %vm497_vm8, %v2516_v28 }
0x2542   :  { %3212 = vmatmul.mubr.msk.f32.gmra.mrb[30].mxu0 %vm497_vm8, %v2517_v29 }
0x2543   :  { %3214 = vmatprep.mubr.msk.f32.mxu0 %vm497_vm8, %v2518_v30 }
0x2546   :  { %3215 = vmatmul.mubr.msk.f32.gmra.mrb[32].mxu0 %vm497_vm8, %v2519_v31 }
0x2609   :  { %v2377_v33 = vpop.f32.mrb[26].mxu0 }
0x260a   :  { %v2381_v35 = vadd.f32 %v2377_v33, %v1659_v32  ;;  %v3188_v36 = vpop.f32.mrb[27].mxu0 }
0x260c   :  { %3477 = vtanh.f32 %v2381_v35  ;;  %v2382_v19 = vmul.f32 0.5, %v2381_v35 }
0x260e   :  { %3479 = vtanh.f32 %v2382_v19 }
0x2611   :  { %v3210_v39 = vpop.f32.mrb[28].mxu0 }
0x2612   :  { %v2629_v43 = vadd.f32 %v3210_v39, %v4070_v37  ;;  %v2623_v45 = vpop.f32.mrb[29].mxu0 }
0x2613   :  { %v2624_v46 = vadd.f32 %v4070_v37, %v2623_v45 }
0x2614   :  { %v2671_v47 = vmul.f32 %v2663_v41, %v2629_v43 }
0x2615   :  { %v2670_v51 = vmul.f32 %v2662_v10, %v2624_v46  ;;  %v3213_v56 = vpop.f32.mrb[30].mxu0 }
0x2616   :  { %v3478_v44 = vpop.eup %3477  ;;  %v2687_v58 = vadd.f32 %v2679_v50, %v2671_v47  ;;  %v2639_v59 = vadd.f32 %v3213_v56, %v4070_v37  ;;  %v2633_v61 = vpop.f32.mrb[31].mxu0 }
0x2617   :  { %v2686_v48 = vadd.f32 %v2678_v49, %v2670_v51  ;;  %v2634_v0 = vadd.f32 %v4070_v37, %v2633_v61  ;;  %2389 = vrot.lane.b32.xlu1 %v3478_v44, %s3495_s28  ;;  %v2669_v49 = vld [vmem:[%s4178_s2 + $0x38] sm:$0xff]  ;;  %v2684_v61 = vld [vmem:[%s4181_s1 + $0x30] sm:$0xff] }
0x2618   :  { %2695 = vst.msk [vmem:[%s4188_s12 + $0x8] sm:$0xff] %vm97_vm4, %v2687_v58  ;;  %v2673_v1 = vmul.f32 %v2665_v34, %v2639_v59  ;;  %v3480_v54 = vpop.eup %3479  ;;  %v2668_v34 = vld [vmem:[%s4178_s2 + $0x30] sm:$0xff]  ;;  %v2685_v44 = vld [vmem:[%s4181_s1 + $0x38] sm:$0xff] }
0x2619   :  { %2694 = vst.msk [vmem:[%s4188_s12] sm:$0xff] %vm97_vm4, %v2686_v48  ;;  %v2672_v3 = vmul.f32 %v2664_v62, %v2634_v0  ;;  %v3216_v55 = vpop.f32.mrb[32].mxu0  ;;  %v2384_v8 = vmul.f32 0.5, %v3480_v54 }
0x261a   :  { %v2689_v9 = vadd.f32 %v2681_v63, %v2673_v1  ;;  %v2649_v11 = vadd.f32 %v3216_v55, %v4070_v37  ;;  %v2643_v40 = vpop.f32.mrb[33].mxu0 }
0x261b   :  { %v2688_v13 = vadd.f32 %v2680_v2, %v2672_v3  ;;  %v2644_v16 = vadd.f32 %v4070_v37, %v2643_v40  ;;  %v2385_v53 = vadd.f32 0.5, %v2384_v8 }
0x261c   :  { %2697 = vst.msk [vmem:[%s4188_s12 + $0x18] sm:$0xff] %vm97_vm4, %v2689_v9  ;;  %v2675_v17 = vmul.f32 %v2667_v6, %v2649_v11 }
0x261d   :  { %2696 = vst.msk [vmem:[%s4188_s12 + $0x10] sm:$0xff] %vm97_vm4, %v2688_v13  ;;  %v2674_v18 = vmul.f32 %v2666_v12, %v2644_v16  ;;  %v2387_v42 = vmul.f32 %v2385_v53, %v4040_v20  ;;  %v1664_v20 = vadd.f32 %v3982_v7, %v3954_v15 }
0x261e   :  { %v2691_v57 = vadd.f32 %v2683_v14, %v2675_v17 }
0x261f   :  { %v2690_v5 = vadd.f32 %v2682_v4, %v2674_v18 }
0x2620   :  { %2699 = vst.msk [vmem:[%s4188_s12 + $0x28] sm:$0xff] %vm97_vm4, %v2691_v57 }
0x2621   :  { %2698 = vst.msk [vmem:[%s4188_s12 + $0x20] sm:$0xff] %vm97_vm4, %v2690_v5 }
0x2689   :  { %v2390_v21 = vpop.permute.xlu1 %2389 }
0x268a   :  { %v2392_v22 = vmul.f32 %v2390_v21, %v2385_v53 }
0x268c   :  { %2394 = vrot.lane.b32.xlu0 %v2392_v22, %s3496_s29 }
0x26fe   :  { %v2395_v60 = vpop.permute.xlu0 %2394 }
0x26ff   :  { %v2397_v23 = vadd.f32 %v2395_v60, %v2387_v42 }
0x2701   :  { %3481 = vtanh.f32 %v2397_v23 }
0x270b   :  { %v3482_v24 = vpop.eup %3481 }
0x270c   :  { %2400 = vrot.lane.b32.xlu1 %v3482_v24, %s3495_s28 }
0x277e   :  { %v2401_v52 = vpop.permute.xlu1 %2400 }
0x277f   :  { %v2403_v38 = vmul.f32 %v2401_v52, %v2385_v53 }
0x2781   :  { %2405 = vrot.lane.b32.xlu0 %v2403_v38, %s3496_s29 }
0x27f3   :  { %v2406_v25 = vpop.permute.xlu0 %2405 }
0x27f4   :  { %2408 = vst.msk [vmem:[#allocation2 + $0x30] sm:$0xff] %vm497_vm8, %v2406_v25  ;;  %3198 = vmatmul.mubr.msk.f32.vlgmr.msra.gmra.mrb[32].mxu1 %vm497_vm8, %v2406_v25 }
0x27fb   :  { %v2520_v26 = vld [vmem:[#allocation2 + $0x30] sm:$0xff] }
0x27fc   :  { %3217 = vmatprep.mubr.msk.f32.mxu0 %vm497_vm8, %v2520_v26 }
0x28c7   :  { %v2482_v27 = vpop.f32.mrb[32].mxu1 }
0x28c8   :  { %v2486_v28 = vadd.f32 %v2482_v27, %v1664_v20  ;;  %v3199_v29 = vpop.f32.mrb[33].mxu1 }
0x28ca   :  { %3483 = vtanh.f32 %v2486_v28  ;;  %v2487_v31 = vmul.f32 0.5, %v2486_v28 }
0x28cc   :  { %3485 = vtanh.f32 %v2487_v31 }
0x28d4   :  { %v3484_v30 = vpop.eup %3483 }
0x28d5   :  { %2494 = vrot.lane.b32.xlu1 %v3484_v30, %s3495_s28 }
0x28d6   :  { %v3486_v32 = vpop.eup %3485 }
0x28d7   :  { %v2489_v33 = vmul.f32 0.5, %v3486_v32 }
0x28d9   :  { %v2490_v35 = vadd.f32 0.5, %v2489_v33 }
0x28db   :  { %v2492_v41 = vmul.f32 %v2490_v35, %v2397_v23 }
0x2947   :  { %v2495_v36 = vpop.permute.xlu1 %2494 }
0x2948   :  { %v2497_v39 = vmul.f32 %v2495_v36, %v2490_v35 }
0x294a   :  { %2499 = vrot.lane.b32.xlu0 %v2497_v39, %s3496_s29 }
0x29bc   :  { %v2500_v43 = vpop.permute.xlu0 %2499 }
0x29bd   :  { %v2502_v45 = vadd.f32 %v2500_v43, %v2492_v41 }
0x29bf   :  { %3487 = vtanh.f32 %v2502_v45 }
0x29c9   :  { %v3488_v15 = vpop.eup %3487 }
0x29ca   :  { %2505 = vrot.lane.b32.xlu1 %v3488_v15, %s3495_s28 }
0x2a3c   :  { %v2506_v7 = vpop.permute.xlu1 %2505 }
0x2a3d   :  { %v2508_v10 = vmul.f32 %v2506_v7, %v2490_v35 }
0x2a3f   :  { %2510 = vrot.lane.b32.xlu0 %v2508_v10, %s3496_s29 }
0x2ab1   :  { %v2511_v50 = vpop.permute.xlu0 %2510 }
0x2ab2   :  { %2513 = vst.msk [vmem:[#allocation2 + $0x38] sm:$0xff] %vm497_vm8, %v2511_v50 }
0x2ab9   :  { %v2521_v46 = vld [vmem:[#allocation2 + $0x38] sm:$0xff] }
0x2aba   :  { %3218 = vmatmul.mubr.msk.f32.gmra.mrb[34].mxu0 %vm497_vm8, %v2521_v46 }
0x2b8d   :  { %v3219_v47 = vpop.f32.mrb[34].mxu0 }
0x2b8e   :  { %v2659_v51 = vadd.f32 %v3219_v47, %v4070_v37  ;;  %v2653_v56 = vpop.f32.mrb[35].mxu0 }
0x2b8f   :  { %v2654_v58 = vadd.f32 %v4070_v37, %v2653_v56 }
0x2b90   :  { %v2677_v59 = vmul.f32 %v2669_v49, %v2659_v51 }
0x2b91   :  { %v2676_v62 = vmul.f32 %v2668_v34, %v2654_v58 }
0x2b92   :  { %v2693_v48 = vadd.f32 %v2685_v44, %v2677_v59 }
0x2b93   :  { %v2692_v63 = vadd.f32 %v2684_v61, %v2676_v62 }
0x2b94   :  { %2701 = vst.msk [vmem:[%s4188_s12 + $0x38] sm:$0xff] %vm97_vm4, %v2693_v48 }
0x2b95   :  { %2700 = vst.msk [vmem:[%s4188_s12 + $0x30] sm:$0xff] %vm97_vm4, %v2692_v63 }

</bundles_post_ra>
